<compile_context>
chip_gen: v5e
topology: v5e:2x2
jax: 0.10.0
libtpu: 0.0.40
codegen_flags: <defaults>
</compile_context>

<pallas_src>
import jax
import jax.numpy as jnp
from jax.experimental import pallas as pl
from jax.experimental.pallas import tpu as pltpu


def mlp_logits_kernel(x_ref, w1_ref, b1_ref, w2_ref, b2_ref, w3_ref, b3_ref, o_ref):
    # Layer 1: Linear(784 -> 256) + ReLU.  bf16 operands, f32 MXU accumulation.
    x = x_ref[...].astype(jnp.bfloat16)
    h1 = jnp.dot(x, w1_ref[...], preferred_element_type=jnp.float32) + b1_ref[...]
    h1 = jnp.maximum(h1, 0.0)
    # Layer 2: Linear(256 -> 64) + ReLU.  Tiny f32 matmul; intermediates never leave VMEM.
    h2 = jnp.dot(h1, w2_ref[...], preferred_element_type=jnp.float32) + b2_ref[...]
    h2 = jnp.maximum(h2, 0.0)
    # Layer 3: Linear(64 -> 10).  Softmax over dim=0 happens in a separate full-batch pass.
    o_ref[...] = jnp.dot(h2, w3_ref[...], preferred_element_type=jnp.float32) + b3_ref[...]


def softmax_dim0_kernel(z_ref, o_ref):
    # F.softmax(..., dim=0): normalize over the batch axis; whole batch is one VMEM tile.
    z = z_ref[...]
    m = jnp.max(z, axis=0, keepdims=True)
    e = jnp.exp(z - m)
    denom = jnp.sum(e, axis=0, keepdims=True)
    o_ref[...] = (e * pl.reciprocal(denom, approx=True)).astype(o_ref.dtype)


def net_forward(x, w1, b1, w2, b2, w3, b3):
    """x: (B, 784) f32.  Weights in (in, out) layout: w1 bf16, w2/w3 f32.  Biases: (1, out) f32."""
    B = x.shape[0]
    # Batch tile: 128 rows when it divides B (fills v5e MXU rows, half a pass on v6e/v7x),
    # otherwise the whole batch in a single grid step.  VMEM use per step is well under the
    # scoped default on every generation (incl. v7x's 64 MiB physical / 32 MiB scoped).
    tb = 128 if (B >= 128 and B % 128 == 0) else B
    grid = (B // tb,)

    # Weight/bias blocks whose index_map ignores the batch index -> resident in VMEM
    # across all grid steps (no re-DMA of the 0.4 MB w1 per batch tile).
    def resident(a):
        return pl.BlockSpec(a.shape, lambda i, _n=a.ndim: (0,) * _n)

    logits = pl.pallas_call(
        mlp_logits_kernel,
        out_shape=jax.ShapeDtypeStruct((B, 10), jnp.float32),
        grid=grid,
        in_specs=[
            pl.BlockSpec((tb, 784), lambda i: (i, 0)),  # x: tiled over batch
            resident(w1), resident(b1),
            resident(w2), resident(b2),
            resident(w3), resident(b3),
        ],
        out_specs=pl.BlockSpec((tb, 10), lambda i: (i, 0)),
        compiler_params=pltpu.CompilerParams(dimension_semantics=("parallel",)),
    )(x, w1, b1, w2, b2, w3, b3)

    # Cross-batch softmax as its own ungridded call: (B, 10) easily fits one VMEM tile.
    # TODO(synk): for very large B (millions of rows) tile this with a two-pass running
    # per-column max/sum instead of a single full-batch tile.
    return pl.pallas_call(
        softmax_dim0_kernel,
        out_shape=jax.ShapeDtypeStruct((B, 10), jnp.float32),
        in_specs=[pl.BlockSpec((B, 10), lambda: (0, 0))],
        out_specs=pl.BlockSpec((B, 10), lambda: (0, 0)),
    )(logits)


def init_linear(key, in_features, out_features, w_dtype=jnp.float32):
    # PyTorch-style uniform(-1/sqrt(fan_in), 1/sqrt(fan_in)).  Weights are generated
    # directly in (in, out) layout so the kernel contraction is canonical (M,K)x(K,N)
    # and no transpose op is ever emitted (host or kernel).
    kw, kb = jax.random.split(key)
    bound = 1.0 / jnp.sqrt(jnp.float32(in_features))
    w = jax.random.uniform(kw, (in_features, out_features), jnp.float32, -bound, bound)
    b = jax.random.uniform(kb, (1, out_features), jnp.float32, -bound, bound)
    return w.astype(w_dtype), b


if __name__ == "__main__":
    key = jax.random.PRNGKey(0)
    kx, k1, k2, k3 = jax.random.split(key, 4)

    B = 256  # two 128-row tiles -> grid=(2,), full MXU row occupancy per tile
    x = jax.random.normal(kx, (B, 784), jnp.float32)
    # w1 (the dominant HBM stream) in bf16; w2/w3 are tiny, kept f32 so h1/h2 need no casts.
    # TODO(synk): int8 (v5e/v6e) or fp8 (v7x) w1 with a per-tensor scale would halve the
    # w1 DMA again if the accuracy budget allows.
    w1, b1 = init_linear(k1, 784, 256, jnp.bfloat16)
    w2, b2 = init_linear(k2, 256, 64, jnp.float32)
    w3, b3 = init_linear(k3, 64, 10, jnp.float32)

    out = net_forward(x, w1, b1, w2, b2, w3, b3)
    jax.block_until_ready(out)

    # Reference check in plain JAX (f32 math with the same bf16-valued w1; softmax over
    # dim=0 to match the PyTorch module).
    w1f = w1.astype(jnp.float32)
    h1 = jnp.maximum(x @ w1f + b1, 0.0)
    h2 = jnp.maximum(h1 @ w2 + b2, 0.0)
    ref = jax.nn.softmax(h2 @ w3 + b3, axis=0)

    assert out.shape == (B, 10)
    # Tolerance covers bf16 layer-1 operands + approx reciprocal in the softmax.
    assert jnp.allclose(out, ref, atol=2e-2, rtol=2e-2), "mismatch vs reference"

    print("KERNEL_OK")
</pallas_src>

<mosaic_0001>
module attributes {stable_mosaic.version = 11 : i64} {
  func.func @mlp_logits_kernel(%arg0: i32, %arg1: memref<128x784xf32, #tpu.memory_space<vmem>>, %arg2: memref<784x256xbf16, #tpu.memory_space<vmem>>, %arg3: memref<1x256xf32, #tpu.memory_space<vmem>>, %arg4: memref<256x64xf32, #tpu.memory_space<vmem>>, %arg5: memref<1x64xf32, #tpu.memory_space<vmem>>, %arg6: memref<64x10xf32, #tpu.memory_space<vmem>>, %arg7: memref<1x10xf32, #tpu.memory_space<vmem>>, %arg8: memref<128x10xf32, #tpu.memory_space<vmem>>) attributes {dimension_semantics = [#tpu.dimension_semantics<parallel>], iteration_bounds = array<i64: 2>, scalar_prefetch = 0 : i64, scratch_operands = 0 : i64, tpu.core_type = #tpu.core_type<tc>, window_params = [{transform_indices = @transform_0, window_bounds = array<i64: 128, 784>}, {pipeline_mode = #tpu.pipeline_mode<synchronous>, transform_indices = @transform_1, window_bounds = array<i64: 784, 256>}, {pipeline_mode = #tpu.pipeline_mode<synchronous>, transform_indices = @transform_2, window_bounds = array<i64: 1, 256>}, {pipeline_mode = #tpu.pipeline_mode<synchronous>, transform_indices = @transform_3, window_bounds = array<i64: 256, 64>}, {pipeline_mode = #tpu.pipeline_mode<synchronous>, transform_indices = @transform_4, window_bounds = array<i64: 1, 64>}, {pipeline_mode = #tpu.pipeline_mode<synchronous>, transform_indices = @transform_5, window_bounds = array<i64: 64, 10>}, {pipeline_mode = #tpu.pipeline_mode<synchronous>, transform_indices = @transform_6, window_bounds = array<i64: 1, 10>}, {transform_indices = @transform_7, window_bounds = array<i64: 128, 10>}]} {
    %c0 = arith.constant 0 : index
    %c0_0 = arith.constant 0 : index
    %0 = vector.load %arg1[%c0, %c0_0] : memref<128x784xf32, #tpu.memory_space<vmem>>, vector<128x784xf32>
    %1 = arith.truncf %0 : vector<128x784xf32> to vector<128x784xbf16>
    %c0_1 = arith.constant 0 : index
    %c0_2 = arith.constant 0 : index
    %2 = vector.load %arg2[%c0_1, %c0_2] : memref<784x256xbf16, #tpu.memory_space<vmem>>, vector<784x256xbf16>
    %cst = arith.constant dense<0.000000e+00> : vector<128x256xf32>
    %3 = tpu.matmul %1, %2, %cst {dimension_numbers = #tpu.dot_dimension_numbers<[1], [0], [0], [1], [0, 0, 1, 1], [], []>} : vector<128x784xbf16>, vector<784x256xbf16>, vector<128x256xf32> -> vector<128x256xf32>
    %c0_3 = arith.constant 0 : index
    %c0_4 = arith.constant 0 : index
    %4 = vector.load %arg3[%c0_3, %c0_4] : memref<1x256xf32, #tpu.memory_space<vmem>>, vector<1x256xf32>
    %5 = vector.broadcast %4 : vector<1x256xf32> to vector<128x256xf32>
    %6 = arith.addf %3, %5 : vector<128x256xf32>
    %cst_5 = arith.constant 0.000000e+00 : f32
    %7 = vector.broadcast %cst_5 : f32 to vector<128x256xf32>
    %8 = arith.maximumf %6, %7 : vector<128x256xf32>
    %c0_6 = arith.constant 0 : index
    %c0_7 = arith.constant 0 : index
    %9 = vector.load %arg4[%c0_6, %c0_7] : memref<256x64xf32, #tpu.memory_space<vmem>>, vector<256x64xf32>
    %cst_8 = arith.constant dense<0.000000e+00> : vector<128x64xf32>
    %10 = tpu.matmul %8, %9, %cst_8 {dimension_numbers = #tpu.dot_dimension_numbers<[1], [0], [0], [1], [0, 0, 1, 1], [], []>} : vector<128x256xf32>, vector<256x64xf32>, vector<128x64xf32> -> vector<128x64xf32>
    %c0_9 = arith.constant 0 : index
    %c0_10 = arith.constant 0 : index
    %11 = vector.load %arg5[%c0_9, %c0_10] : memref<1x64xf32, #tpu.memory_space<vmem>>, vector<1x64xf32>
    %12 = vector.broadcast %11 : vector<1x64xf32> to vector<128x64xf32>
    %13 = arith.addf %10, %12 : vector<128x64xf32>
    %cst_11 = arith.constant 0.000000e+00 : f32
    %14 = vector.broadcast %cst_11 : f32 to vector<128x64xf32>
    %15 = arith.maximumf %13, %14 : vector<128x64xf32>
    %c0_12 = arith.constant 0 : index
    %c0_13 = arith.constant 0 : index
    %16 = vector.load %arg6[%c0_12, %c0_13] : memref<64x10xf32, #tpu.memory_space<vmem>>, vector<64x10xf32>
    %cst_14 = arith.constant dense<0.000000e+00> : vector<128x10xf32>
    %17 = tpu.matmul %15, %16, %cst_14 {dimension_numbers = #tpu.dot_dimension_numbers<[1], [0], [0], [1], [0, 0, 1, 1], [], []>} : vector<128x64xf32>, vector<64x10xf32>, vector<128x10xf32> -> vector<128x10xf32>
    %c0_15 = arith.constant 0 : index
    %c0_16 = arith.constant 0 : index
    %18 = vector.load %arg7[%c0_15, %c0_16] : memref<1x10xf32, #tpu.memory_space<vmem>>, vector<1x10xf32>
    %19 = vector.broadcast %18 : vector<1x10xf32> to vector<128x10xf32>
    %20 = arith.addf %17, %19 : vector<128x10xf32>
    %c0_17 = arith.constant 0 : index
    %c0_18 = arith.constant 0 : index
    %21 = vector.load %arg8[%c0_17, %c0_18] : memref<128x10xf32, #tpu.memory_space<vmem>>, vector<128x10xf32>
    tpu.vector_store %arg8[%c0_17, %c0_18], %20 {strides = array<i32>} : memref<128x10xf32, #tpu.memory_space<vmem>>, vector<128x10xf32>,
    return
  }
  func.func @transform_0(%arg0: i32) -> (i32, i32) {
    %c0_i32 = arith.constant 0 : i32
    %c0_i32_0 = arith.constant 0 : i32
    return %arg0, %c0_i32 : i32, i32
  }
  func.func @transform_1(%arg0: i32) -> (i32, i32) {
    %c0_i32 = arith.constant 0 : i32
    %c0_i32_0 = arith.constant 0 : i32
    %c0_i32_1 = arith.constant 0 : i32
    return %c0_i32, %c0_i32_0 : i32, i32
  }
  func.func @transform_2(%arg0: i32) -> (i32, i32) {
    %c0_i32 = arith.constant 0 : i32
    %c0_i32_0 = arith.constant 0 : i32
    %c0_i32_1 = arith.constant 0 : i32
    return %c0_i32, %c0_i32_0 : i32, i32
  }
  func.func @transform_3(%arg0: i32) -> (i32, i32) {
    %c0_i32 = arith.constant 0 : i32
    %c0_i32_0 = arith.constant 0 : i32
    %c0_i32_1 = arith.constant 0 : i32
    return %c0_i32, %c0_i32_0 : i32, i32
  }
  func.func @transform_4(%arg0: i32) -> (i32, i32) {
    %c0_i32 = arith.constant 0 : i32
    %c0_i32_0 = arith.constant 0 : i32
    %c0_i32_1 = arith.constant 0 : i32
    return %c0_i32, %c0_i32_0 : i32, i32
  }
  func.func @transform_5(%arg0: i32) -> (i32, i32) {
    %c0_i32 = arith.constant 0 : i32
    %c0_i32_0 = arith.constant 0 : i32
    %c0_i32_1 = arith.constant 0 : i32
    return %c0_i32, %c0_i32_0 : i32, i32
  }
  func.func @transform_6(%arg0: i32) -> (i32, i32) {
    %c0_i32 = arith.constant 0 : i32
    %c0_i32_0 = arith.constant 0 : i32
    %c0_i32_1 = arith.constant 0 : i32
    return %c0_i32, %c0_i32_0 : i32, i32
  }
  func.func @transform_7(%arg0: i32) -> (i32, i32) {
    %c0_i32 = arith.constant 0 : i32
    %c0_i32_0 = arith.constant 0 : i32
    return %arg0, %c0_i32 : i32, i32
  }
}

</mosaic_0001>

<bundles_post_ra>
// kernel: tpu_custom_call.1
= control target key start
LH: loop header
LB: loop body
LE: loop exit
PB: predicated region body
PF: predicated region fallthrough
CT: control target
= control target key end

     0   :  { %s2788_s24 = smov 0   ;;  %s4288_s0 = inlined_call_operand.vmem [shape: f32[256,784], index: 0, kind: input, shape index: {}]   ;;  %s4289_s1 = inlined_call_operand.vmem [shape: bf16[784,256], index: 1, kind: input, shape index: {}]   ;;  %s4290_s2 = inlined_call_operand.vmem [shape: f32[1,256], index: 2, kind: input, shape index: {}]   ;;  %s4291_s3 = inlined_call_operand.vmem [shape: f32[256,64], index: 3, kind: input, shape index: {}]   ;;  %s4292_s4 = inlined_call_operand.vmem [shape: f32[1,64], index: 4, kind: input, shape index: {}]   ;;  %s4293_s5 = inlined_call_operand.vmem [shape: f32[64,10], index: 5, kind: input, shape index: {}]   ;;  %s4294_s6 = inlined_call_operand.vmem [shape: f32[1,10], index: 6, kind: input, shape index: {}]   ;;  %s4295_s7 = inlined_call_operand.vmem [shape: f32[256,10], index: 7, kind: output, shape index: {}]  }
   0x1 LB: > { %s2172_s25 = sadd.s32 4294967295, %s2746_s24   ;;  %p2176_p0 = scmp.ge.s32.totalorder %s2746_s24, 1  ;;  %s2746_s24 = sphi %s2788_s24, %s17_s24  }
   0x2   : > { %p239_p1 = scmp.lt.s32.totalorder %s2746_s24, 3 }
   0x4   : > { %p240_p2 = pnand %p2176_p0, %p239_p1 }
   0x6   : > { %243 = sbr.rel (%p240_p2) target bundleno = 976 (0x3d0), region = 48 }
   0xb   : > { %v2239_v0 = vld [vmem:[%s4289_s1 + $0x70] sm:$0xf]  ;;  %v2622_v1 = vld [vmem:[%s4289_s1 + $0x74] sm:$0xf0]  ;;  %v2231_v2 = vld [vmem:[%s4289_s1 + $0x60] sm:$0xf] }
   0xc   : > { %v2240_v3 = vor.u32 %v2622_v1, %v2239_v0  ;;  %v2620_v4 = vld [vmem:[%s4289_s1 + $0x64] sm:$0xf0]  ;;  %v2223_v6 = vld [vmem:[%s4289_s1 + $0x50] sm:$0xf]  ;;  %v2618_v7 = vld [vmem:[%s4289_s1 + $0x54] sm:$0xf0] }
   0xd   : > { %v2232_v5 = vor.u32 %v2620_v4, %v2231_v2  ;;  %v2224_v8 = vor.u32 %v2618_v7, %v2223_v6  ;;  %v2215_v9 = vld [vmem:[%s4289_s1 + $0x40] sm:$0xf]  ;;  %v2616_v10 = vld [vmem:[%s4289_s1 + $0x44] sm:$0xf0]  ;;  %s2177_s19 = sshll.u32 %s2172_s25, 4  ;;  %vm1048_vm0 = vcmask 130048  }
   0xe   : > { %2705 = vmatpush.bf16.msra.mxu1 %v2240_v3  ;;  %2706 = vmatpush.bf16.msra.mxu2 %v2240_v3  ;;  %v2216_v11 = vor.u32 %v2616_v10, %v2215_v9  ;;  %p273_p3 = scmp.lt.s32.totalorder %s2177_s19, 31  ;;  %v2207_v12 = vld [vmem:[%s4289_s1 + $0x30] sm:$0xf]  ;;  %v2614_v13 = vld [vmem:[%s4289_s1 + $0x34] sm:$0xf0]  ;;  %vm1985_vm1 = vcmask 523264  }
   0xf   : > { %2707 = vmatpush.bf16.msra.mxu3 %v2240_v3  ;;  %1073 = vmatpush.bf16.msra.mxu0 %v2240_v3  ;;  %v2208_v14 = vor.u32 %v2614_v13, %v2207_v12  ;;  %v2199_v15 = vld [vmem:[%s4289_s1 + $0x20] sm:$0xf]  ;;  %v2612_v16 = vld [vmem:[%s4289_s1 + $0x24] sm:$0xf0]  ;;  %v2191_v18 = vld [vmem:[%s4289_s1 + $0x10] sm:$0xf] }
  0x10   : > { %s4339_s19 = smov (!%p273_p3, %s2177_s19), 31  ;;  %v2200_v17 = vor.u32 %v2612_v16, %v2199_v15  ;;  %v2610_v19 = vld [vmem:[%s4289_s1 + $0x14] sm:$0xf0]  ;;  %v2183_v21 = vld [vmem:[%s4289_s1] sm:$0xf]  ;;  %vm2099_vm2 = vcmask 80896  }
  0x11   : > { %s2729_s29 = smul.u32 56, %s4339_s19  ;;  %v2192_v20 = vor.u32 %v2610_v19, %v2191_v18  ;;  %v2608_v22 = vld [vmem:[%s4289_s1 + $0x4] sm:$0xf0]  ;;  %v2303_v23 = vld [vmem:[%s4289_s1 + $0xf0] sm:$0xf]  ;;  %s2180_s18 = sshll.u32 %s4339_s19, 3 }
  0x12   : > { %2708 = vmatpush.bf16.msra.mxu1 %v2232_v5  ;;  %2709 = vmatpush.bf16.msra.mxu2 %v2232_v5  ;;  %v2638_v24 = vld [vmem:[%s4289_s1 + $0xf4] sm:$0xf0]  ;;  %v2367_v25 = vld [vmem:[%s4289_s1 + $0x170] sm:$0xf]  ;;  %v2184_v30 = vor.u32 %v2608_v22, %v2183_v21  ;;  %v2295_v34 = vld [vmem:[%s4289_s1 + $0xe0] sm:$0xf]  ;;  %s4251_s23 = scalar_lea.vmem %s4295_s7, %s2180_s18 }
  0x13   : > { %2710 = vmatpush.bf16.msra.mxu3 %v2232_v5  ;;  %1074 = vmatpush.bf16.msra.mxu0 %v2232_v5  ;;  %s2844_s13 = scalar_lea.vmem %s4288_s0, %s2729_s29  ;;  %v2654_v26 = vld [vmem:[%s4289_s1 + $0x174] sm:$0xf0]  ;;  %v2431_v28 = vld [vmem:[%s4289_s1 + $0x1f0] sm:$0xf]  ;;  %v2304_v35 = vor.u32 %v2638_v24, %v2303_v23  ;;  %v2636_v38 = vld [vmem:[%s4289_s1 + $0xe4] sm:$0xf0] }
  0x14   : > { %v314_v27 = vld [vmem:[%s2844_s13 + $0xe0] sm:$0xff]  ;;  %v2670_v29 = vld [vmem:[%s4289_s1 + $0x1f4] sm:$0xf0]  ;;  %v2368_v39 = vor.u32 %v2654_v26, %v2367_v25  ;;  %v2495_v42 = vld [vmem:[%s4289_s1 + $0x270] sm:$0xf]  ;;  %v2296_v52 = vor.u32 %v2636_v38, %v2295_v34 }
  0x15   : > { %v321_v31 = vld [vmem:[%s2844_s13 + $0x118] sm:$0xff]  ;;  %v342_v32 = vld [vmem:[%s2844_s13 + $0x1c0] sm:$0xff]  ;;  %v2432_v40 = vor.u32 %v2670_v29, %v2431_v28  ;;  %v2652_v46 = vld [vmem:[%s4289_s1 + $0x164] sm:$0xf0] }
  0x16   : > { %2711 = vmatpush.bf16.msra.mxu1 %v2224_v8  ;;  %2712 = vmatpush.bf16.msra.mxu2 %v2224_v8  ;;  %v349_v33 = vld [vmem:[%s2844_s13 + $0x1f8] sm:$0xff]  ;;  %v370_v36 = vld [vmem:[%s2844_s13 + $0x2a0] sm:$0xff]  ;;  %v2891_v44 = vpack.c.bf16 %v321_v31, %v314_v27  ;;  %v2668_v48 = vld [vmem:[%s4289_s1 + $0x1e4] sm:$0xf0] }
  0x17   : > { %2713 = vmatpush.bf16.msra.mxu3 %v2224_v8  ;;  %1075 = vmatpush.bf16.msra.mxu0 %v2224_v8  ;;  %v377_v37 = vld [vmem:[%s2844_s13 + $0x2d8] sm:$0xff]  ;;  %v2359_v41 = vld [vmem:[%s4289_s1 + $0x160] sm:$0xf]  ;;  %v2893_v45 = vpack.c.bf16 %v349_v33, %v342_v32  ;;  %v2287_v53 = vld [vmem:[%s4289_s1 + $0xd0] sm:$0xf] }
  0x18   : > { %v2686_v43 = vld [vmem:[%s4289_s1 + $0x274] sm:$0xf0]  ;;  %v2423_v47 = vld [vmem:[%s4289_s1 + $0x1e0] sm:$0xf]  ;;  %v2904_v49 = vpack.c.bf16 %v377_v37, %v370_v36  ;;  %v2360_v56 = vor.u32 %v2652_v46, %v2359_v41  ;;  %v2351_v58 = vld [vmem:[%s4289_s1 + $0x150] sm:$0xf] }
  0x19   : > { %v286_v50 = vld [vmem:[%s2844_s13] sm:$0xff]  ;;  %v293_v51 = vld [vmem:[%s2844_s13 + $0x38] sm:$0xff]  ;;  %v2496_v55 = vor.u32 %v2686_v43, %v2495_v42  ;;  %v2424_v57 = vor.u32 %v2668_v48, %v2423_v47  ;;  %v2684_v60 = vld [vmem:[%s4289_s1 + $0x264] sm:$0xf0] }
  0x1a   : > { %2714 = vmatpush.bf16.msra.mxu1 %v2216_v11  ;;  %2715 = vmatpush.bf16.msra.mxu2 %v2216_v11  ;;  %v2634_v54 = vld [vmem:[%s4289_s1 + $0xd4] sm:$0xf0]  ;;  %v2487_v59 = vld [vmem:[%s4289_s1 + $0x260] sm:$0xf]  ;;  %v2928_v62 = vpack.c.bf16 %v293_v51, %v286_v50  ;;  %v2415_v63 = vld [vmem:[%s4289_s1 + $0x1d0] sm:$0xf] }
  0x1b   : > { %2716 = vmatpush.bf16.msra.mxu3 %v2216_v11  ;;  %1076 = vmatpush.bf16.msra.mxu0 %v2216_v11  ;;  %v2650_v61 = vld [vmem:[%s4289_s1 + $0x154] sm:$0xf0]  ;;  %v2279_v1 = vld [vmem:[%s4289_s1 + $0xc0] sm:$0xf]  ;;  %v2288_v2 = vor.u32 %v2634_v54, %v2287_v53  ;;  %v2632_v3 = vld [vmem:[%s4289_s1 + $0xc4] sm:$0xf0]  ;;  %v2488_v5 = vor.u32 %v2684_v60, %v2487_v59 }
  0x1c   : > { %v2666_v0 = vld [vmem:[%s4289_s1 + $0x1d4] sm:$0xf0]  ;;  %v2343_v4 = vld [vmem:[%s4289_s1 + $0x140] sm:$0xf]  ;;  %v2352_v6 = vor.u32 %v2650_v61, %v2351_v58  ;;  %v2479_v8 = vld [vmem:[%s4289_s1 + $0x250] sm:$0xf]  ;;  %v2280_v13 = vor.u32 %v2632_v3, %v2279_v1 }
  0x1d   : > { %v2416_v7 = vor.u32 %v2666_v0, %v2415_v63  ;;  %v2682_v9 = vld [vmem:[%s4289_s1 + $0x254] sm:$0xf0]  ;;  %v2648_v10 = vld [vmem:[%s4289_s1 + $0x144] sm:$0xf0]  ;;  %v2407_v11 = vld [vmem:[%s4289_s1 + $0x1c0] sm:$0xf] }
  0x1e   : > { %2717 = vmatpush.bf16.msra.mxu1 %v2208_v14  ;;  %2718 = vmatpush.bf16.msra.mxu2 %v2208_v14  ;;  %v2664_v12 = vld [vmem:[%s4289_s1 + $0x1c4] sm:$0xf0]  ;;  %v2630_v15 = vld [vmem:[%s4289_s1 + $0xb4] sm:$0xf0]  ;;  %v2480_v16 = vor.u32 %v2682_v9, %v2479_v8  ;;  %v328_v19 = vld [vmem:[%s2844_s13 + $0x150] sm:$0xff] }
  0x1f   : > { %2719 = vmatpush.bf16.msra.mxu3 %v2208_v14  ;;  %1077 = vmatpush.bf16.msra.mxu0 %v2208_v14  ;;  %v2271_v14 = vld [vmem:[%s4289_s1 + $0xb0] sm:$0xf]  ;;  %v2408_v18 = vor.u32 %v2664_v12, %v2407_v11  ;;  %v2471_v22 = vld [vmem:[%s4289_s1 + $0x240] sm:$0xf]  ;;  %v2680_v23 = vld [vmem:[%s4289_s1 + $0x244] sm:$0xf0] }
  0x20   : > { %v2335_v21 = vld [vmem:[%s4289_s1 + $0x130] sm:$0xf]  ;;  %v2646_v24 = vld [vmem:[%s4289_s1 + $0x134] sm:$0xf0]  ;;  %v363_v28 = vld [vmem:[%s2844_s13 + $0x268] sm:$0xff]  ;;  %v2472_v34 = vor.u32 %v2680_v23, %v2471_v22 }
  0x21   : > { %v2399_v25 = vld [vmem:[%s4289_s1 + $0x1b0] sm:$0xf]  ;;  %v2662_v26 = vld [vmem:[%s4289_s1 + $0x1b4] sm:$0xf0]  ;;  %v391_v31 = vld [vmem:[%s2844_s13 + $0x348] sm:$0xff] }
  0x22   : > { %2720 = vmatpush.bf16.msra.mxu1 %v2200_v17  ;;  %2721 = vmatpush.bf16.msra.mxu2 %v2200_v17  ;;  %v356_v27 = vld [vmem:[%s2844_s13 + $0x230] sm:$0xff]  ;;  %v2263_v32 = vld [vmem:[%s4289_s1 + $0xa0] sm:$0xf]  ;;  %v2628_v33 = vld [vmem:[%s4289_s1 + $0xa4] sm:$0xf0]  ;;  %v2400_v36 = vor.u32 %v2662_v26, %v2399_v25 }
  0x23   : > { %2722 = vmatpush.bf16.msra.mxu3 %v2200_v17  ;;  %1078 = vmatpush.bf16.msra.mxu0 %v2200_v17  ;;  %v2344_v17 = vor.u32 %v2648_v10, %v2343_v4  ;;  %v384_v29 = vld [vmem:[%s2844_s13 + $0x310] sm:$0xff]  ;;  %v2327_v37 = vld [vmem:[%s4289_s1 + $0x120] sm:$0xf]  ;;  %v3009_v41 = vpack.c.bf16 %v363_v28, %v356_v27  ;;  %v2644_v42 = vld [vmem:[%s4289_s1 + $0x124] sm:$0xf0]  ;;  %v2264_v51 = vor.u32 %v2628_v33, %v2263_v32 }
  0x24   : > { %v2463_v38 = vld [vmem:[%s4289_s1 + $0x230] sm:$0xf]  ;;  %v2391_v43 = vld [vmem:[%s4289_s1 + $0x1a0] sm:$0xf]  ;;  %v2660_v46 = vld [vmem:[%s4289_s1 + $0x1a4] sm:$0xf0]  ;;  %v3020_v47 = vpack.c.bf16 %v391_v31, %v384_v29 }
  0x25   : > { %v300_v48 = vld [vmem:[%s2844_s13 + $0x70] sm:$0xff]  ;;  %v307_v50 = vld [vmem:[%s2844_s13 + $0xa8] sm:$0xff]  ;;  %v2626_v53 = vld [vmem:[%s4289_s1 + $0x94] sm:$0xf0] }
  0x26   : > { %2723 = vmatpush.bf16.msra.mxu1 %v2192_v20  ;;  %2724 = vmatpush.bf16.msra.mxu2 %v2192_v20  ;;  %v2455_v58 = vld [vmem:[%s4289_s1 + $0x220] sm:$0xf]  ;;  %v2676_v59 = vld [vmem:[%s4289_s1 + $0x224] sm:$0xf0]  ;;  %v2642_v60 = vld [vmem:[%s4289_s1 + $0x114] sm:$0xf0]  ;;  %v3044_v61 = vpack.c.bf16 %v307_v50, %v300_v48 }
  0x27   : > { %2725 = vmatpush.bf16.msra.mxu3 %v2192_v20  ;;  %1079 = vmatpush.bf16.msra.mxu0 %v2192_v20  ;;  %v335_v20 = vld [vmem:[%s2844_s13 + $0x188] sm:$0xff]  ;;  %v2383_v63 = vld [vmem:[%s4289_s1 + $0x190] sm:$0xf]  ;;  %v2658_v0 = vld [vmem:[%s4289_s1 + $0x194] sm:$0xf0]  ;;  %v2456_v4 = vor.u32 %v2676_v59, %v2455_v58 }
  0x28   : > { %v2624_v3 = vld [vmem:[%s4289_s1 + $0x84] sm:$0xf0]  ;;  %v2447_v8 = vld [vmem:[%s4289_s1 + $0x210] sm:$0xf]  ;;  %v2674_v9 = vld [vmem:[%s4289_s1 + $0x214] sm:$0xf0] }
  0x29   : > { %v2640_v10 = vld [vmem:[%s4289_s1 + $0x104] sm:$0xf0]  ;;  %v2375_v11 = vld [vmem:[%s4289_s1 + $0x180] sm:$0xf]  ;;  %v289_v26 = vld [vmem:[%s2844_s13 + $0x18] sm:$0xff] }
  0x2a   : > { %2726 = vmatpush.bf16.msra.mxu1 %v2184_v30  ;;  %2727 = vmatpush.bf16.msra.mxu2 %v2184_v30  ;;  %v2656_v12 = vld [vmem:[%s4289_s1 + $0x184] sm:$0xf0]  ;;  %v294_v22 = vld [vmem:[%s2844_s13 + $0x40] sm:$0xff]  ;;  %v296_v27 = vld [vmem:[%s2844_s13 + $0x50] sm:$0xff] }
  0x2b   : > { %2728 = vmatpush.bf16.msra.mxu3 %v2184_v30  ;;  %1080 = vmatpush.bf16.msra.mxu0 %v2184_v30  ;;  %v2272_v30 = vor.u32 %v2630_v15, %v2271_v14  ;;  %v2702_v14 = vld [vmem:[%s4289_s1 + $0x2f4] sm:$0xf0]  ;;  %v295_v25 = vld [vmem:[%s2844_s13 + $0x48] sm:$0xff]  ;;  %v2551_v29 = vld [vmem:[%s4289_s1 + $0x2e0] sm:$0xf]  ;;  %v3106_v33 = vpack.c.bf16 %v296_v27, %v289_v26 }
  0x2c   : > { %v302_v48 = vld [vmem:[%s2844_s13 + $0x80] sm:$0xff]  ;;  %v309_v50 = vld [vmem:[%s2844_s13 + $0xb8] sm:$0xff] }
  0x2d   : > { %1091 = vmatmul.bf16.vlgmr.msra.gmra.mxu1 %v2891_v44  ;;  %1101 = vmatmul.bf16.vlgmr.msra.gmra.mxu2 %v2893_v45  ;;  %v2535_v59 = vld [vmem:[%s4289_s1 + $0x2c0] sm:$0xf] }
  0x2e   : > { %1122 = vmatpush.bf16.msrb.mxu1 %v2304_v35  ;;  %1171 = vmatpush.bf16.msrb.mxu2 %v2368_v39  ;;  %v2336_v35 = vor.u32 %v2646_v24, %v2335_v21  ;;  %v2678_v39 = vld [vmem:[%s4289_s1 + $0x234] sm:$0xf0]  ;;  %v287_v21 = vld [vmem:[%s2844_s13 + $0x8] sm:$0xff]  ;;  %v288_v24 = vld [vmem:[%s2844_s13 + $0x10] sm:$0xff] }
  0x2f   : > { %1220 = vmatpush.bf16.msrb.mxu3 %v2432_v40  ;;  %1269 = vmatpush.bf16.msrb.mxu0 %v2496_v55  ;;  %v3007_v40 = vpack.c.bf16 %v335_v20, %v328_v19  ;;  %v2464_v54 = vor.u32 %v2678_v39, %v2463_v38  ;;  %v2328_v55 = vor.u32 %v2644_v42, %v2327_v37  ;;  %v2439_v19 = vld [vmem:[%s4289_s1 + $0x200] sm:$0xf]  ;;  %v2672_v20 = vld [vmem:[%s4289_s1 + $0x204] sm:$0xf0]  ;;  %v2543_v38 = vld [vmem:[%s4289_s1 + $0x2d0] sm:$0xf] }
  0x30   : > { %1111 = vmatmul.bf16.vlgmr.msra.gmra.mxu3 %v2904_v49  ;;  %1081 = vmatmul.bf16.vlgmr.msra.gmra.mxu0 %v2928_v62  ;;  %v2440_v28 = vor.u32 %v2672_v20, %v2439_v19  ;;  %v3102_v31 = vpack.c.bf16 %v294_v22, %v287_v21  ;;  %v3104_v32 = vpack.c.bf16 %v295_v25, %v288_v24  ;;  %v2698_v39 = vld [vmem:[%s4289_s1 + $0x2d4] sm:$0xf0]  ;;  %v331_v19 = vld [vmem:[%s2844_s13 + $0x168] sm:$0xff]  ;;  %v338_v20 = vld [vmem:[%s2844_s13 + $0x1a0] sm:$0xff] }
  0x31   : > { %v2544_v42 = vor.u32 %v2698_v39, %v2543_v38  ;;  %v332_v24 = vld [vmem:[%s2844_s13 + $0x170] sm:$0xff]  ;;  %v339_v25 = vld [vmem:[%s2844_s13 + $0x1a8] sm:$0xff]  ;;  %v2519_v27 = vld [vmem:[%s4289_s1 + $0x2a0] sm:$0xf] }
  0x32   : > { %1123 = vmatpush.bf16.msrb.mxu1 %v2296_v52  ;;  %1172 = vmatpush.bf16.msrb.mxu2 %v2360_v56  ;;  %v2255_v52 = vld [vmem:[%s4289_s1 + $0x90] sm:$0xf]  ;;  %v2392_v56 = vor.u32 %v2660_v46, %v2391_v43  ;;  %v301_v43 = vld [vmem:[%s2844_s13 + $0x78] sm:$0xff]  ;;  %v3190_v26 = vpack.c.bf16 %v339_v25, %v332_v24  ;;  %v2615_v24 = vld [vmem:[%s4289_s1 + $0x44] sm:$0xf] }
  0x33   : > { %1221 = vmatpush.bf16.msrb.mxu3 %v2424_v57  ;;  %1270 = vmatpush.bf16.msrb.mxu0 %v2488_v5  ;;  %v2319_v57 = vld [vmem:[%s4289_s1 + $0x110] sm:$0xf]  ;;  %v2256_v1 = vor.u32 %v2626_v53, %v2255_v52  ;;  %v310_v52 = vld [vmem:[%s2844_s13 + $0xc0] sm:$0xff]  ;;  %v345_v38 = vld [vmem:[%s2844_s13 + $0x1d8] sm:$0xff] }
  0x34   : > { %v2320_v5 = vor.u32 %v2642_v60, %v2319_v57  ;;  %v308_v46 = vld [vmem:[%s2844_s13 + $0xb0] sm:$0xff]  ;;  %v311_v57 = vld [vmem:[%s2844_s13 + $0xc8] sm:$0xff] }
  0x35   : > { %v3128_v53 = vpack.c.bf16 %v308_v46, %v301_v43  ;;  %v2696_v60 = vld [vmem:[%s4289_s1 + $0x2c4] sm:$0xf0]  ;;  %v352_v39 = vld [vmem:[%s2844_s13 + $0x210] sm:$0xff]  ;;  %v2217_v25 = vld [vmem:[%s4289_s1 + $0x48] sm:$0xf0] }
  0x36   : > { %1124 = vmatpush.bf16.msrb.mxu1 %v2288_v2  ;;  %1173 = vmatpush.bf16.msrb.mxu2 %v2352_v6  ;;  %v2247_v2 = vld [vmem:[%s4289_s1 + $0x80] sm:$0xf]  ;;  %v2384_v6 = vor.u32 %v2658_v0, %v2383_v63  ;;  %v2536_v63 = vor.u32 %v2696_v60, %v2535_v59  ;;  %v315_v0 = vld [vmem:[%s2844_s13 + $0xe8] sm:$0xff]  ;;  %v3210_v46 = vpack.c.bf16 %v352_v39, %v345_v38  ;;  %v2241_v60 = vld [vmem:[%s4289_s1 + $0x78] sm:$0xf0] }
  0x37   : > { %1222 = vmatpush.bf16.msrb.mxu3 %v2416_v7  ;;  %1271 = vmatpush.bf16.msrb.mxu0 %v2480_v16  ;;  %v2311_v7 = vld [vmem:[%s4289_s1 + $0x100] sm:$0xf]  ;;  %v2248_v15 = vor.u32 %v2624_v3, %v2247_v2  ;;  %v2448_v16 = vor.u32 %v2674_v9, %v2447_v8  ;;  %v316_v2 = vld [vmem:[%s2844_s13 + $0xf0] sm:$0xff]  ;;  %v323_v3 = vld [vmem:[%s2844_s13 + $0x128] sm:$0xff] }
  0x38   : > { %v318_v9 = vld [vmem:[%s2844_s13 + $0x100] sm:$0xff]  ;;  %4311 = vst [vmem:[#allocation3_spill] sm:$0xff] %v3210_v46 }
  0x39   : > { %v2503_v39 = vld [vmem:[%s4289_s1 + $0x280] sm:$0xf] }
  0x3a   : > { %1125 = vmatpush.bf16.msrb.mxu1 %v2280_v13  ;;  %1174 = vmatpush.bf16.msrb.mxu2 %v2344_v17  ;;  %v2559_v13 = vld [vmem:[%s4289_s1 + $0x2f0] sm:$0xf]  ;;  %v2312_v17 = vor.u32 %v2640_v10, %v2311_v7  ;;  %v3156_v7 = vpack.c.bf16 %v323_v3, %v316_v2  ;;  %v325_v10 = vld [vmem:[%s2844_s13 + $0x138] sm:$0xff] }
  0x3b   : > { %1223 = vmatpush.bf16.msrb.mxu3 %v2408_v18  ;;  %1272 = vmatpush.bf16.msrb.mxu0 %v2472_v34  ;;  %v2376_v18 = vor.u32 %v2656_v12, %v2375_v11  ;;  %v2560_v23 = vor.u32 %v2702_v14, %v2559_v13  ;;  %v290_v34 = vld [vmem:[%s2844_s13 + $0x20] sm:$0xff]  ;;  %v3164_v11 = vpack.c.bf16 %v325_v10, %v318_v9  ;;  %v2527_v12 = vld [vmem:[%s4289_s1 + $0x2b0] sm:$0xf]  ;;  %v2694_v13 = vld [vmem:[%s4289_s1 + $0x2b4] sm:$0xf0] }
  0x3c   : > { %v2528_v14 = vor.u32 %v2694_v13, %v2527_v12  ;;  %v357_v3 = vld [vmem:[%s2844_s13 + $0x238] sm:$0xff]  ;;  %v2637_v10 = vld [vmem:[%s4289_s1 + $0xf4] sm:$0xf]  ;;  %v358_v12 = vld [vmem:[%s2844_s13 + $0x240] sm:$0xff] }
  0x3d   : > { %1096 = vmatmul.bf16.gmra.mxu1 %v3007_v40  ;;  %1106 = vmatmul.bf16.gmra.mxu2 %v3009_v41  ;;  %v2225_v9 = vld [vmem:[%s4289_s1 + $0x58] sm:$0xf0] }
  0x3e   : > { %1126 = vmatpush.bf16.msrb.mxu1 %v2272_v30  ;;  %1175 = vmatpush.bf16.msrb.mxu2 %v2336_v35  ;;  %v2700_v30 = vld [vmem:[%s4289_s1 + $0x2e4] sm:$0xf0]  ;;  %v297_v35 = vld [vmem:[%s2844_s13 + $0x58] sm:$0xff] }
  0x3f   : > { %1224 = vmatpush.bf16.msrb.mxu3 %v2400_v36  ;;  %1273 = vmatpush.bf16.msrb.mxu0 %v2464_v54  ;;  %v2552_v36 = vor.u32 %v2700_v30, %v2551_v29  ;;  %v3112_v37 = vpack.c.bf16 %v297_v35, %v290_v34  ;;  %v3130_v54 = vpack.c.bf16 %v309_v50, %v302_v48  ;;  %v343_v30 = vld [vmem:[%s2844_s13 + $0x1c8] sm:$0xff]  ;;  %v350_v34 = vld [vmem:[%s2844_s13 + $0x200] sm:$0xff]  ;;  %v344_v35 = vld [vmem:[%s2844_s13 + $0x1d0] sm:$0xff] }
  0x40   : > { %1116 = vmatmul.bf16.gmra.mxu3 %v3020_v47  ;;  %1086 = vmatmul.bf16.gmra.mxu0 %v3044_v61  ;;  %v346_v48 = vld [vmem:[%s2844_s13 + $0x1e0] sm:$0xff]  ;;  %v353_v50 = vld [vmem:[%s2844_s13 + $0x218] sm:$0xff] }
  0x41   : > { %v365_v13 = vld [vmem:[%s2844_s13 + $0x278] sm:$0xff] }
  0x42   : > { %1127 = vmatpush.bf16.msrb.mxu1 %v2264_v51  ;;  %1176 = vmatpush.bf16.msrb.mxu2 %v2328_v55  ;;  %v303_v51 = vld [vmem:[%s2844_s13 + $0x88] sm:$0xff] }
  0x43   : > { %1225 = vmatpush.bf16.msrb.mxu3 %v2392_v56  ;;  %1274 = vmatpush.bf16.msrb.mxu0 %v2456_v4  ;;  %v3132_v55 = vpack.c.bf16 %v310_v52, %v303_v51  ;;  %v304_v56 = vld [vmem:[%s2844_s13 + $0x90] sm:$0xff]  ;;  %v317_v4 = vld [vmem:[%s2844_s13 + $0xf8] sm:$0xff]  ;;  %v3216_v51 = vpack.c.bf16 %v353_v50, %v346_v48  ;;  %v2688_v48 = vld [vmem:[%s4289_s1 + $0x284] sm:$0xf0] }
  0x44   : > { %v3138_v58 = vpack.c.bf16 %v311_v57, %v304_v56  ;;  %v2511_v52 = vld [vmem:[%s4289_s1 + $0x290] sm:$0xf]  ;;  %v2690_v56 = vld [vmem:[%s4289_s1 + $0x294] sm:$0xf0]  ;;  %v2621_v57 = vld [vmem:[%s4289_s1 + $0x74] sm:$0xf] }
  0x45   : > { %4312 = vst [vmem:[#allocation4_spill] sm:$0xff] %v3216_v51  ;;  %v2512_v59 = vor.u32 %v2690_v56, %v2511_v52  ;;  %v2613_v50 = vld [vmem:[%s4289_s1 + $0x34] sm:$0xf]  ;;  %v2504_v52 = vor.u32 %v2688_v48, %v2503_v39  ;;  %v2209_v56 = vld [vmem:[%s4289_s1 + $0x38] sm:$0xf0] }
  0x46   : > { %1128 = vmatpush.bf16.msrb.mxu1 %v2256_v1  ;;  %1177 = vmatpush.bf16.msrb.mxu2 %v2320_v5  ;;  %v322_v1 = vld [vmem:[%s2844_s13 + $0x120] sm:$0xff]  ;;  %v324_v5 = vld [vmem:[%s2844_s13 + $0x130] sm:$0xff]  ;;  %v2185_v48 = vld [vmem:[%s4289_s1 + $0x8] sm:$0xf0] }
  0x47   : > { %1226 = vmatpush.bf16.msrb.mxu3 %v2384_v6  ;;  %1275 = vmatpush.bf16.msrb.mxu0 %v2448_v16  ;;  %v3154_v6 = vpack.c.bf16 %v322_v1, %v315_v0  ;;  %v3158_v8 = vpack.c.bf16 %v324_v5, %v317_v4  ;;  %v336_v16 = vld [vmem:[%s2844_s13 + $0x190] sm:$0xff]  ;;  %v2619_v0 = vld [vmem:[%s4289_s1 + $0x64] sm:$0xf]  ;;  %v2233_v1 = vld [vmem:[%s4289_s1 + $0x68] sm:$0xf0] }
  0x48   : > { %v2236_v2 = vor.u32 %v2619_v0, %v2233_v1  ;;  %v364_v4 = vld [vmem:[%s2844_s13 + $0x270] sm:$0xff]  ;;  %v2567_v0 = vld [vmem:[%s4289_s1 + $0x300] sm:$0xf]  ;;  %v2704_v1 = vld [vmem:[%s4289_s1 + $0x304] sm:$0xf0] }
  0x49   : > { %v2617_v5 = vld [vmem:[%s4289_s1 + $0x54] sm:$0xf]  ;;  %v2607_v39 = vld [vmem:[%s4289_s1 + $0x4] sm:$0xf] }
  0x4a   : > { %1129 = vmatpush.bf16.msrb.mxu1 %v2248_v15  ;;  %1178 = vmatpush.bf16.msrb.mxu2 %v2312_v17  ;;  %v329_v15 = vld [vmem:[%s2844_s13 + $0x158] sm:$0xff]  ;;  %v330_v17 = vld [vmem:[%s2844_s13 + $0x160] sm:$0xff] }
  0x4b   : > { %1227 = vmatpush.bf16.msrb.mxu3 %v2376_v18  ;;  %1276 = vmatpush.bf16.msrb.mxu0 %v2440_v28  ;;  %v337_v18 = vld [vmem:[%s2844_s13 + $0x198] sm:$0xff]  ;;  %v3180_v21 = vpack.c.bf16 %v336_v16, %v329_v15  ;;  %v2692_v28 = vld [vmem:[%s4289_s1 + $0x2a4] sm:$0xf0] }
  0x4c   : > { %v3182_v22 = vpack.c.bf16 %v337_v18, %v330_v17  ;;  %v2520_v29 = vor.u32 %v2692_v28, %v2519_v27  ;;  %v2305_v15 = vld [vmem:[%s4289_s1 + $0xf8] sm:$0xf0]  ;;  %v359_v16 = vld [vmem:[%s2844_s13 + $0x248] sm:$0xff]  ;;  %v366_v17 = vld [vmem:[%s2844_s13 + $0x280] sm:$0xff] }
  0x4d   : > { %1130 = vmatmul.bf16.vlgmr.msrb.gmra.mxu1 %v3102_v31  ;;  %1179 = vmatmul.bf16.vlgmr.msrb.gmra.mxu2 %v3104_v32  ;;  %v2308_v18 = vor.u32 %v2637_v10, %v2305_v15  ;;  %v2635_v27 = vld [vmem:[%s4289_s1 + $0xe4] sm:$0xf]  ;;  %v3269_v28 = vpack.c.bf16 %v366_v17, %v359_v16  ;;  %v2609_v15 = vld [vmem:[%s4289_s1 + $0x14] sm:$0xf]  ;;  %v2193_v16 = vld [vmem:[%s4289_s1 + $0x18] sm:$0xf0] }
  0x4e   : > { %1318 = vmatpush.bf16.msra.mxu1 %v2560_v23  ;;  %v3184_v23 = vpack.c.bf16 %v338_v20, %v331_v19  ;;  %v3256_v19 = vpack.c.bf16 %v364_v4, %v357_v3  ;;  %v3258_v20 = vpack.c.bf16 %v365_v13, %v358_v12  ;;  %v2568_v3 = vor.u32 %v2704_v1, %v2567_v0  ;;  %v2201_v4 = vld [vmem:[%s4289_s1 + $0x28] sm:$0xf0]  ;;  %v2629_v17 = vld [vmem:[%s4289_s1 + $0xb4] sm:$0xf]  ;;  %v3361_v1 = vld [vmem:[%s4290_s2] sm:$0x3] }
  0x4f   : > { %1465 = vmatpush.bf16.msra.mxu0 %v2308_v18  ;;  %4314 = vst [vmem:[#allocation6_spill] sm:$0xff] %v3269_v28  ;;  %v371_v13 = vld [vmem:[%s2844_s13 + $0x2a8] sm:$0xff]  ;;  %v372_v18 = vld [vmem:[%s2844_s13 + $0x2b0] sm:$0xff] }
  0x50   : > { %1228 = vmatmul.bf16.vlgmr.msrb.gmra.mxu3 %v3106_v33  ;;  %1277 = vmatmul.bf16.vlgmr.msrb.gmra.mxu0 %v3112_v37  ;;  %4313 = vst [vmem:[#allocation5_spill] sm:$0xff] %v3258_v20 }
  0x51   : > { %1374 = vmatpush.bf16.msra.mxu2 %v2568_v3  ;;  %v2653_v3 = vld [vmem:[%s4289_s1 + $0x174] sm:$0xf] }
  0x52   : > { %1319 = vmatpush.bf16.msra.mxu1 %v2552_v36  ;;  %v351_v36 = vld [vmem:[%s2844_s13 + $0x208] sm:$0xff] }
  0x53   : > { %v3208_v43 = vpack.c.bf16 %v351_v36, %v344_v35  ;;  %v2220_v35 = vor.u32 %v2615_v24, %v2217_v25  ;;  %v379_v24 = vld [vmem:[%s2844_s13 + $0x2e8] sm:$0xff]  ;;  %v2273_v25 = vld [vmem:[%s4289_s1 + $0xb8] sm:$0xf0] }
  0x55   : > { %4310 = vst [vmem:[#allocation2_spill] sm:$0xff] %v3208_v43 }
  0x56   : > { %1320 = vmatpush.bf16.msra.mxu1 %v2544_v42  ;;  %v3206_v42 = vpack.c.bf16 %v350_v34, %v343_v30  ;;  %v367_v30 = vld [vmem:[%s2844_s13 + $0x288] sm:$0xff] }
  0x57   : > { %v2297_v34 = vld [vmem:[%s4289_s1 + $0xe8] sm:$0xf0] }
  0x58   : > { %v2300_v36 = vor.u32 %v2635_v27, %v2297_v34  ;;  %v373_v27 = vld [vmem:[%s2844_s13 + $0x2b8] sm:$0xff]  ;;  %v2276_v34 = vor.u32 %v2629_v17, %v2273_v25 }
  0x5a   : > { %1321 = vmatpush.bf16.msra.mxu1 %v2536_v63  ;;  %v2244_v63 = vor.u32 %v2621_v57, %v2241_v60  ;;  %1466 = vmatpush.bf16.msra.mxu0 %v2300_v36  ;;  %v2633_v57 = vld [vmem:[%s4289_s1 + $0xd4] sm:$0xf]  ;;  %v2212_v60 = vor.u32 %v2613_v50, %v2209_v56  ;;  %v3338_v36 = vpack.c.bf16 %v379_v24, %v372_v18  ;;  %v2627_v50 = vld [vmem:[%s4289_s1 + $0xa4] sm:$0xf]  ;;  %v2249_v24 = vld [vmem:[%s4289_s1 + $0x88] sm:$0xf0] }
  0x5b   : > { %v2623_v18 = vld [vmem:[%s4289_s1 + $0x84] sm:$0xf] }
  0x5c   : > { %1416 = vmatpush.bf16.msra.mxu3 %v2244_v63  ;;  %4316 = vst [vmem:[#allocation8_spill] sm:$0xff] %v3338_v36 }
  0x5d   : > { %1135 = vmatmul.bf16.gmra.mxu1 %v3128_v53  ;;  %1184 = vmatmul.bf16.gmra.mxu2 %v3130_v54 }
  0x5e   : > { %1322 = vmatpush.bf16.msra.mxu1 %v2528_v14  ;;  %v2228_v14 = vor.u32 %v2617_v5, %v2225_v9  ;;  %v2631_v5 = vld [vmem:[%s4289_s1 + $0xc4] sm:$0xf]  ;;  %v2281_v9 = vld [vmem:[%s4289_s1 + $0xc8] sm:$0xf0] }
  0x5f   : > { %v2284_v12 = vor.u32 %v2631_v5, %v2281_v9  ;;  %v2625_v5 = vld [vmem:[%s4289_s1 + $0x94] sm:$0xf] }
  0x60   : > { %1233 = vmatmul.bf16.gmra.mxu3 %v3132_v55  ;;  %1282 = vmatmul.bf16.gmra.mxu0 %v3138_v58 }
  0x61   : > { %1417 = vmatpush.bf16.msra.mxu3 %v2236_v2  ;;  %v2611_v2 = vld [vmem:[%s4289_s1 + $0x24] sm:$0xf] }
  0x62   : > { %1323 = vmatpush.bf16.msra.mxu1 %v2520_v29  ;;  %v360_v29 = vld [vmem:[%s2844_s13 + $0x250] sm:$0xff]  ;;  %v2204_v10 = vor.u32 %v2611_v2, %v2201_v4  ;;  %v2369_v4 = vld [vmem:[%s4289_s1 + $0x178] sm:$0xf0] }
  0x63   : > { %v3278_v38 = vpack.c.bf16 %v367_v30, %v360_v29  ;;  %v380_v29 = vld [vmem:[%s2844_s13 + $0x2f0] sm:$0xff]  ;;  %v2196_v30 = vor.u32 %v2609_v15, %v2193_v16 }
  0x64   : > { %v3351_v56 = vpack.c.bf16 %v380_v29, %v373_v27  ;;  %v2252_v29 = vor.u32 %v2623_v18, %v2249_v24  ;;  %v2651_v18 = vld [vmem:[%s4289_s1 + $0x164] sm:$0xf]  ;;  %v2361_v24 = vld [vmem:[%s4289_s1 + $0x168] sm:$0xf0] }
  0x65   : > { %1418 = vmatpush.bf16.msra.mxu3 %v2228_v14  ;;  %4315 = vst [vmem:[#allocation7_spill] sm:$0xff] %v3278_v38  ;;  %v378_v14 = vld [vmem:[%s2844_s13 + $0x2e0] sm:$0xff] }
  0x66   : > { %1324 = vmatpush.bf16.msra.mxu1 %v2512_v59  ;;  %v2289_v59 = vld [vmem:[%s4289_s1 + $0xd8] sm:$0xf0]  ;;  %4317 = vst [vmem:[#allocation9_spill] sm:$0xff] %v3351_v56 }
  0x67   : > { %v2292_v63 = vor.u32 %v2633_v57, %v2289_v59  ;;  %v374_v57 = vld [vmem:[%s2844_s13 + $0x2c0] sm:$0xff]  ;;  %v381_v59 = vld [vmem:[%s2844_s13 + $0x2f8] sm:$0xff] }
  0x68   : > { %v3365_v2 = vpack.c.bf16 %v381_v59, %v374_v57  ;;  %v387_v57 = vld [vmem:[%s2844_s13 + $0x328] sm:$0xff]  ;;  %v394_v59 = vld [vmem:[%s2844_s13 + $0x360] sm:$0xff] }
  0x69   : > { %1419 = vmatpush.bf16.msra.mxu3 %v2220_v35  ;;  %1467 = vmatpush.bf16.msra.mxu0 %v2292_v63  ;;  %v3336_v35 = vpack.c.bf16 %v378_v14, %v371_v13  ;;  %v2188_v63 = vor.u32 %v2607_v39, %v2185_v48  ;;  %v3381_v13 = vperm.slane %v3361_v1, 0  ;;  %v392_v39 = vld [vmem:[%s2844_s13 + $0x350] sm:$0xff]  ;;  %v386_v48 = vld [vmem:[%s2844_s13 + $0x320] sm:$0xff] }
  0x6a   : > { %1325 = vmatpush.bf16.msra.mxu1 %v2504_v52  ;;  %4318 = vst [vmem:[#allocation10_spill] sm:$0xff] %v3365_v2 }
  0x6d   : > { %1140 = vmatmul.bf16.gmra.mxu1 %v3154_v6  ;;  %1189 = vmatmul.bf16.gmra.mxu2 %v3156_v7 }
  0x6e   : > { %1420 = vmatpush.bf16.msra.mxu3 %v2212_v60  ;;  %1468 = vmatpush.bf16.msra.mxu0 %v2284_v12  ;;  %v2265_v60 = vld [vmem:[%s4289_s1 + $0xa8] sm:$0xf0]  ;;  %v2257_v12 = vld [vmem:[%s4289_s1 + $0x98] sm:$0xf0] }
  0x6f   : > { %v2268_v0 = vor.u32 %v2627_v50, %v2265_v60  ;;  %v2260_v14 = vor.u32 %v2625_v5, %v2257_v12  ;;  %v393_v50 = vld [vmem:[%s2844_s13 + $0x358] sm:$0xff]  ;;  %v3416_v12 = vpack.c.bf16 %v394_v59, %v387_v57 }
  0x70   : > { %1238 = vmatmul.bf16.gmra.mxu3 %v3158_v8  ;;  %1287 = vmatmul.bf16.gmra.mxu0 %v3164_v11 }
  0x71   : > { %4320 = vst [vmem:[#allocation12_spill] sm:$0xff] %v3416_v12 }
  0x72   : > { %1421 = vmatpush.bf16.msra.mxu3 %v2204_v10  ;;  %1469 = vmatpush.bf16.msra.mxu0 %v2276_v34  ;;  %v2372_v10 = vor.u32 %v2653_v3, %v2369_v4  ;;  %v3409_v4 = vpack.c.bf16 %v393_v50, %v386_v48 }
  0x74   : > { %1514 = vmatpush.bf16.msrb.mxu1 %v2372_v10  ;;  %4319 = vst [vmem:[#allocation11_spill] sm:$0xff] %v3409_v4 }
  0x76   : > { %1422 = vmatpush.bf16.msra.mxu3 %v2196_v30  ;;  %1470 = vmatpush.bf16.msra.mxu0 %v2268_v0  ;;  %v385_v30 = vld [vmem:[%s2844_s13 + $0x318] sm:$0xff] }
  0x77   : > { %v3407_v3 = vpack.c.bf16 %v392_v39, %v385_v30  ;;  %v2364_v30 = vor.u32 %v2651_v18, %v2361_v24 }
  0x79   : > { %1515 = vmatpush.bf16.msrb.mxu1 %v2364_v30 }
  0x7a   : > { %1423 = vmatpush.bf16.msra.mxu3 %v2188_v63  ;;  %1471 = vmatpush.bf16.msra.mxu0 %v2260_v14  ;;  %v388_v14 = vld [vmem:[%s2844_s13 + $0x330] sm:$0xff] }
  0x7d   : > { %1145 = vmatmul.bf16.gmra.mxu1 %v3180_v21  ;;  %1194 = vmatmul.bf16.gmra.mxu2 %v3182_v22 }
  0x7e   : > { %1472 = vmatpush.bf16.msra.mxu0 %v2252_v29 }
  0x80   : > { %1243 = vmatmul.bf16.gmra.mxu3 %v3184_v23  ;;  %1292 = vmatmul.bf16.gmra.mxu0 %v3190_v26 }
  0x8d   : > { %1150 = vmatmul.bf16.gmra.mxu1 %v3206_v42  ;;  %1199 = vmatmul.bf16.gmra.mxu2 %v3208_v43 }
  0x90   : > { %1248 = vmatmul.bf16.gmra.mxu3 %v3210_v46  ;;  %1297 = vmatmul.bf16.gmra.mxu0 %v3216_v51  ;;  %v306_v51 = vld [vmem:[%s2844_s13 + $0xa0] sm:$0xff]  ;;  %v313_v46 = vld [vmem:[%s2844_s13 + $0xd8] sm:$0xff] }
  0x9d   : > { %1155 = vmatmul.bf16.gmra.mxu1 %v3256_v19  ;;  %1204 = vmatmul.bf16.gmra.mxu2 %v3258_v20 }
  0xa0   : > { %1253 = vmatmul.bf16.gmra.mxu3 %v3269_v28  ;;  %1302 = vmatmul.bf16.gmra.mxu0 %v3278_v38  ;;  %v305_v28 = vld [vmem:[%s2844_s13 + $0x98] sm:$0xff] }
  0xaa   : > { %v3349_v52 = vpop.f32.mrf.mxu1 }
  0xad   : > { %1160 = vmatmul.bf16.gmra.mxu1 %v3336_v35  ;;  %1209 = vmatmul.bf16.gmra.mxu2 %v3338_v36  ;;  %v1082_v9 = vpop.f32.mrf.mxu0 }
  0xae   : > { %v1083_v18 = vadd.f32 %v1082_v9, %v3381_v13  ;;  %v2649_v9 = vld [vmem:[%s4289_s1 + $0x154] sm:$0xf] }
  0xb0   : > { %1258 = vmatmul.bf16.gmra.mxu3 %v3351_v56  ;;  %v1102_v15 = vpop.f32.mrf.mxu2  ;;  %1307 = vmatmul.bf16.gmra.mxu0 %v3365_v2 }
  0xb1   : > { %v3384_v16 = vadd.f32 %v1102_v15, %v3381_v13  ;;  %v395_v15 = vld [vmem:[%s2844_s13 + $0x368] sm:$0xff] }
  0xb2   : > { %v3393_v25 = vpop.f32.mrf.mxu1 }
  0xb3   : > { %v1112_v17 = vpop.f32.mrf.mxu3 }
  0xb4   : > { %v3396_v27 = vadd.f32 %v1112_v17, %v3381_v13  ;;  %v3422_v17 = vpack.c.bf16 %v395_v15, %v388_v14  ;;  %v298_v14 = vld [vmem:[%s2844_s13 + $0x60] sm:$0xff]  ;;  %v292_v15 = vld [vmem:[%s2844_s13 + $0x30] sm:$0xff] }
  0xb5   : > { %v1084_v34 = vpop.f32.mrf.mxu0 }
  0xb6   : > { %4321 = vst [vmem:[#allocation13_spill] sm:$0xff] %v3422_v17 }
  0xb8   : > { %v1104_v60 = vpop.f32.mrf.mxu2 }
  0xb9   : > { %v3405_v63 = vadd.f32 %v1104_v60, %v3381_v13  ;;  %v291_v60 = vld [vmem:[%s2844_s13 + $0x28] sm:$0xff] }
  0xba   : > { %v3411_v5 = vpop.f32.mrf.mxu1 }
  0xbb   : > { %v1114_v0 = vpop.f32.mrf.mxu3 }
  0xbc   : > { %v3414_v10 = vadd.f32 %v1114_v0, %v3381_v13 }
  0xbd   : > { %1165 = vmatmul.bf16.gmra.mxu1 %v3407_v3  ;;  %1214 = vmatmul.bf16.gmra.mxu2 %v3409_v4  ;;  %v1087_v29 = vpop.f32.mrf.mxu0  ;;  %v3448_v4 = vpack.c.bf16 %v298_v14, %v291_v60 }
  0xc0   : > { %1263 = vmatmul.bf16.gmra.mxu3 %v3416_v12  ;;  %v1107_v39 = vpop.f32.mrf.mxu2  ;;  %1312 = vmatmul.bf16.gmra.mxu0 %v3422_v17  ;;  %v299_v12 = vld [vmem:[%s2844_s13 + $0x68] sm:$0xff] }
  0xc1   : > { %v3432_v48 = vadd.f32 %v1107_v39, %v3381_v13  ;;  %v3450_v17 = vpack.c.bf16 %v299_v12, %v292_v15  ;;  %v2353_v12 = vld [vmem:[%s4289_s1 + $0x158] sm:$0xf0]  ;;  %v1085_v15 = vadd.f32 %v1084_v34, %v3381_v13 }
  0xc2   : > { %v3435_v57 = vpop.f32.mrf.mxu1  ;;  %v2356_v14 = vor.u32 %v2649_v9, %v2353_v12  ;;  %v1088_v9 = vadd.f32 %v1087_v29, %v3381_v13 }
  0xc3   : > { %v1117_v50 = vpop.f32.mrf.mxu3  ;;  %4322 = vst [vmem:[#allocation14_spill] sm:$0xff] %v3450_v17 }
  0xc4   : > { %v3438_v59 = vadd.f32 %v1117_v50, %v3381_v13  ;;  %1516 = vmatpush.bf16.msrb.mxu1 %v2356_v14 }
  0xc5   : > { %v1089_v0 = vpop.f32.mrf.mxu0 }
  0xc8   : > { %v1109_v24 = vpop.f32.mrf.mxu2 }
  0xc9   : > { %v3446_v30 = vadd.f32 %v1109_v24, %v3381_v13 }
  0xca   : > { %v1131_v50 = vpop.f32.mrf.mxu1 }
  0xcb   : > { %v1119_v39 = vpop.f32.mrf.mxu3  ;;  %v1132_v56 = vadd.f32 %v1131_v50, %v1083_v18 }
  0xcc   : > { %v3453_v2 = vadd.f32 %v1119_v39, %v3381_v13 }
  0xcd   : > { %1326 = vmatmul.bf16.vlgmr.msra.gmra.mxu1 %v3448_v4  ;;  %2573 = vmatmul.msk.bf16.vlgmr.msra.gmra.mxu2 %vm1048_vm0, %v3450_v17  ;;  %v1278_v60 = vpop.f32.mrf.mxu0 }
  0xd0   : > { %1424 = vmatmul.bf16.vlgmr.msra.gmra.mxu3 %v2928_v62  ;;  %v1180_v18 = vpop.f32.mrf.mxu2  ;;  %1473 = vmatmul.bf16.vlgmr.msra.gmra.mxu0 %v3102_v31  ;;  %v312_v62 = vld [vmem:[%s2844_s13 + $0xd0] sm:$0xff] }
  0xd1   : > { %v1181_v24 = vadd.f32 %v1180_v18, %v1132_v56  ;;  %v3474_v14 = vpack.c.bf16 %v312_v62, %v305_v28  ;;  %v3476_v56 = vpack.c.bf16 %v313_v46, %v306_v51  ;;  %v2345_v46 = vld [vmem:[%s4289_s1 + $0x148] sm:$0xf0] }
  0xd2   : > { %v1133_v50 = vpop.f32.mrf.mxu1 }
  0xd3   : > { %v1229_v39 = vpop.f32.mrf.mxu3  ;;  %v1134_v17 = vadd.f32 %v1133_v50, %v1085_v15 }
  0xd4   : > { %v1230_v36 = vadd.f32 %v1229_v39, %v1181_v24 }
  0xd5   : > { %v1280_v20 = vpop.f32.mrf.mxu0 }
  0xd6   : > { %v3467_v38 = vadd.f32 %v1278_v60, %v1230_v36  ;;  %v2647_v36 = vld [vmem:[%s4289_s1 + $0x144] sm:$0xf] }
  0xd7   : > { %v2348_v51 = vor.u32 %v2647_v36, %v2345_v46 }
  0xd8   : > { %v1182_v12 = vpop.f32.mrf.mxu2 }
  0xd9   : > { %v1183_v34 = vadd.f32 %v1182_v12, %v1134_v17  ;;  %1517 = vmatpush.bf16.msrb.mxu1 %v2348_v51 }
  0xda   : > { %v1136_v31 = vpop.f32.mrf.mxu1 }
  0xdb   : > { %v1231_v43 = vpop.f32.mrf.mxu3  ;;  %v1137_v18 = vadd.f32 %v1136_v31, %v1088_v9  ;;  %v319_v9 = vld [vmem:[%s2844_s13 + $0x108] sm:$0xff] }
  0xdc   : > { %v1232_v15 = vadd.f32 %v1231_v43, %v1183_v34  ;;  %v320_v34 = vld [vmem:[%s2844_s13 + $0x110] sm:$0xff]  ;;  %v327_v31 = vld [vmem:[%s2844_s13 + $0x148] sm:$0xff] }
  0xdd   : > { %1331 = vmatmul.bf16.gmra.mxu1 %v3474_v14  ;;  %2574 = vmatmul.msk.bf16.gmra.mxu2 %vm1048_vm0, %v3476_v56  ;;  %v1283_v43 = vpop.f32.mrf.mxu0  ;;  %v3502_v51 = vpack.c.bf16 %v327_v31, %v320_v34 }
  0xde   : > { %v3478_v24 = vadd.f32 %v1280_v20, %v1232_v15  ;;  %v1090_v20 = vadd.f32 %v1089_v0, %v3381_v13  ;;  %v1093_v0 = vadd.f32 %v3349_v52, %v3381_v13  ;;  %v2645_v52 = vld [vmem:[%s4289_s1 + $0x134] sm:$0xf] }
  0xe0   : > { %1429 = vmatmul.bf16.gmra.mxu3 %v3044_v61  ;;  %v1185_v28 = vpop.f32.mrf.mxu2  ;;  %1478 = vmatmul.bf16.gmra.mxu0 %v3128_v53  ;;  %v326_v61 = vld [vmem:[%s2844_s13 + $0x140] sm:$0xff] }
  0xe1   : > { %v1186_v17 = vadd.f32 %v1185_v28, %v1137_v18  ;;  %v3500_v18 = vpack.c.bf16 %v326_v61, %v319_v9 }
  0xe2   : > { %v1138_v60 = vpop.f32.mrf.mxu1 }
  0xe3   : > { %v1234_v29 = vpop.f32.mrf.mxu3  ;;  %v1139_v39 = vadd.f32 %v1138_v60, %v1090_v20 }
  0xe4   : > { %v1235_v50 = vadd.f32 %v1234_v29, %v1186_v17  ;;  %v2337_v17 = vld [vmem:[%s4289_s1 + $0x138] sm:$0xf0] }
  0xe5   : > { %v1285_v12 = vpop.f32.mrf.mxu0  ;;  %v2340_v60 = vor.u32 %v2645_v52, %v2337_v17  ;;  %v1098_v52 = vadd.f32 %v3411_v5, %v3381_v13  ;;  %v2643_v5 = vld [vmem:[%s4289_s1 + $0x124] sm:$0xf] }
  0xe6   : > { %v3492_v62 = vadd.f32 %v1283_v43, %v1235_v50  ;;  %v1095_v50 = vadd.f32 %v3393_v25, %v3381_v13 }
  0xe7   : > { %1518 = vmatpush.bf16.msrb.mxu1 %v2340_v60 }
  0xe8   : > { %v1187_v15 = vpop.f32.mrf.mxu2 }
  0xe9   : > { %v1188_v36 = vadd.f32 %v1187_v15, %v1139_v39 }
  0xea   : > { %v1141_v53 = vpop.f32.mrf.mxu1 }
  0xeb   : > { %v1236_v46 = vpop.f32.mrf.mxu3  ;;  %v1142_v20 = vadd.f32 %v1141_v53, %v1093_v0  ;;  %v333_v0 = vld [vmem:[%s2844_s13 + $0x178] sm:$0xff] }
  0xec   : > { %v1237_v28 = vadd.f32 %v1236_v46, %v1188_v36  ;;  %v340_v36 = vld [vmem:[%s2844_s13 + $0x1b0] sm:$0xff]  ;;  %v334_v46 = vld [vmem:[%s2844_s13 + $0x180] sm:$0xff]  ;;  %v341_v53 = vld [vmem:[%s2844_s13 + $0x1b8] sm:$0xff] }
  0xed   : > { %1336 = vmatmul.bf16.gmra.mxu1 %v3500_v18  ;;  %2575 = vmatmul.msk.bf16.gmra.mxu2 %vm1048_vm0, %v3502_v51  ;;  %v1288_v29 = vpop.f32.mrf.mxu0  ;;  %v3529_v60 = vpack.c.bf16 %v341_v53, %v334_v46 }
  0xee   : > { %v3504_v43 = vadd.f32 %v1285_v12, %v1237_v28 }
  0xf0   : > { %1434 = vmatmul.bf16.gmra.mxu3 %v2891_v44  ;;  %v1190_v39 = vpop.f32.mrf.mxu2  ;;  %1483 = vmatmul.bf16.gmra.mxu0 %v3154_v6 }
  0xf1   : > { %v1191_v9 = vadd.f32 %v1190_v39, %v1142_v20  ;;  %v3527_v20 = vpack.c.bf16 %v340_v36, %v333_v0 }
  0xf2   : > { %v1143_v61 = vpop.f32.mrf.mxu1 }
  0xf3   : > { %v1239_v12 = vpop.f32.mrf.mxu3  ;;  %v1144_v34 = vadd.f32 %v1143_v61, %v1095_v50 }
  0xf4   : > { %v1240_v31 = vadd.f32 %v1239_v12, %v1191_v9  ;;  %v2329_v9 = vld [vmem:[%s4289_s1 + $0x128] sm:$0xf0] }
  0xf5   : > { %v1290_v44 = vpop.f32.mrf.mxu0  ;;  %v2332_v61 = vor.u32 %v2643_v5, %v2329_v9 }
  0xf6   : > { %v3519_v15 = vadd.f32 %v1288_v29, %v1240_v31  ;;  %v1100_v31 = vadd.f32 %v3435_v57, %v3381_v13 }
  0xf7   : > { %1519 = vmatpush.bf16.msrb.mxu1 %v2332_v61 }
  0xf8   : > { %v1192_v28 = vpop.f32.mrf.mxu2 }
  0xf9   : > { %v1193_v17 = vadd.f32 %v1192_v28, %v1144_v34 }
  0xfa   : > { %v1146_v6 = vpop.f32.mrf.mxu1 }
  0xfb   : > { %v1241_v25 = vpop.f32.mrf.mxu3  ;;  %v1147_v39 = vadd.f32 %v1146_v6, %v1098_v52  ;;  %v347_v52 = vld [vmem:[%s2844_s13 + $0x1e8] sm:$0xff] }
  0xfc   : > { %v1242_v50 = vadd.f32 %v1241_v25, %v1193_v17  ;;  %v354_v17 = vld [vmem:[%s2844_s13 + $0x220] sm:$0xff]  ;;  %v348_v25 = vld [vmem:[%s2844_s13 + $0x1f0] sm:$0xff]  ;;  %v355_v6 = vld [vmem:[%s2844_s13 + $0x228] sm:$0xff] }
  0xfd   : > { %1341 = vmatmul.bf16.gmra.mxu1 %v3527_v20  ;;  %2576 = vmatmul.msk.bf16.gmra.mxu2 %vm1048_vm0, %v3529_v60  ;;  %v1293_v12 = vpop.f32.mrf.mxu0  ;;  %v3552_v61 = vpack.c.bf16 %v354_v17, %v347_v52  ;;  %v3554_v13 = vpack.c.bf16 %v355_v6, %v348_v25  ;;  %v2497_v52 = vld [vmem:[%s4289_s1 + $0x278] sm:$0xf0]  ;;  %v2667_v17 = vld [vmem:[%s4289_s1 + $0x1e4] sm:$0xf]  ;;  %v2425_v25 = vld [vmem:[%s4289_s1 + $0x1e8] sm:$0xf0] }
  0xfe   : > { %v3531_v29 = vadd.f32 %v1290_v44, %v1242_v50 }
 0x100   : > { %1439 = vmatmul.bf16.gmra.mxu3 %v3007_v40  ;;  %v1195_v34 = vpop.f32.mrf.mxu2  ;;  %1488 = vmatmul.bf16.gmra.mxu0 %v3180_v21 }
 0x101   : > { %v1196_v0 = vadd.f32 %v1195_v34, %v1147_v39  ;;  %v2433_v34 = vld [vmem:[%s4289_s1 + $0x1f8] sm:$0xf0] }
 0x102   : > { %v1148_v36 = vpop.f32.mrf.mxu1 }
 0x103   : > { %v1244_v44 = vpop.f32.mrf.mxu3  ;;  %v1149_v46 = vadd.f32 %v1148_v36, %v1100_v31  ;;  %v2685_v36 = vld [vmem:[%s4289_s1 + $0x274] sm:$0xf] }
 0x104   : > { %v1245_v53 = vadd.f32 %v1244_v44, %v1196_v0  ;;  %v2321_v44 = vld [vmem:[%s4289_s1 + $0x118] sm:$0xf0] }
 0x105   : > { %v1295_v40 = vpop.f32.mrf.mxu0 }
 0x106   : > { %v3546_v28 = vadd.f32 %v1293_v12, %v1245_v53  ;;  %v2669_v12 = vld [vmem:[%s4289_s1 + $0x1f4] sm:$0xf] }
 0x107   : > { %v2436_v31 = vor.u32 %v2669_v12, %v2433_v34 }
 0x108   : > { %v1197_v50 = vpop.f32.mrf.mxu2 }
 0x109   : > { %v1198_v5 = vadd.f32 %v1197_v50, %v1149_v46  ;;  %1563 = vmatpush.bf16.msrb.mxu2 %v2436_v31  ;;  %v2417_v31 = vld [vmem:[%s4289_s1 + $0x1d8] sm:$0xf0] }
 0x10a   : > { %v1151_v57 = vpop.f32.mrf.mxu1 }
 0x10b   : > { %v1246_v9 = vpop.f32.mrf.mxu3  ;;  %v1152_v21 = vadd.f32 %v1151_v57, %v3384_v16  ;;  %v2641_v16 = vld [vmem:[%s4289_s1 + $0x114] sm:$0xf]  ;;  %v2489_v57 = vld [vmem:[%s4289_s1 + $0x268] sm:$0xf0] }
 0x10c   : > { %v1247_v39 = vadd.f32 %v1246_v9, %v1198_v5  ;;  %v2324_v53 = vor.u32 %v2641_v16, %v2321_v44  ;;  %v2683_v9 = vld [vmem:[%s4289_s1 + $0x264] sm:$0xf]  ;;  %v361_v16 = vld [vmem:[%s2844_s13 + $0x258] sm:$0xff]  ;;  %v368_v44 = vld [vmem:[%s2844_s13 + $0x290] sm:$0xff] }
 0x10d   : > { %1346 = vmatmul.bf16.gmra.mxu1 %v3552_v61  ;;  %2577 = vmatmul.msk.bf16.gmra.mxu2 %vm1048_vm0, %v3554_v13  ;;  %v1298_v46 = vpop.f32.mrf.mxu0  ;;  %v2492_v12 = vor.u32 %v2683_v9, %v2489_v57  ;;  %v2409_v9 = vld [vmem:[%s4289_s1 + $0x1c8] sm:$0xf0] }
 0x10e   : > { %v3563_v0 = vadd.f32 %v1295_v40, %v1247_v39  ;;  %v2500_v40 = vor.u32 %v2685_v36, %v2497_v52  ;;  %1520 = vmatpush.bf16.msrb.mxu1 %v2324_v53  ;;  %v2681_v52 = vld [vmem:[%s4289_s1 + $0x254] sm:$0xf] }
 0x110   : > { %1444 = vmatmul.bf16.gmra.mxu3 %v2893_v45  ;;  %v1200_v6 = vpop.f32.mrf.mxu2  ;;  %v2428_v45 = vor.u32 %v2667_v17, %v2425_v25  ;;  %1493 = vmatmul.bf16.gmra.mxu0 %v3206_v42  ;;  %v2665_v42 = vld [vmem:[%s4289_s1 + $0x1d4] sm:$0xf]  ;;  %v362_v25 = vld [vmem:[%s2844_s13 + $0x260] sm:$0xff] }
 0x111   : > { %v1201_v50 = vadd.f32 %v1200_v6, %v1152_v21  ;;  %1612 = vmatpush.bf16.msrb.mxu3 %v2500_v40  ;;  %v2420_v36 = vor.u32 %v2665_v42, %v2417_v31  ;;  %v2701_v40 = vld [vmem:[%s4289_s1 + $0x2f4] sm:$0xf]  ;;  %v369_v6 = vld [vmem:[%s2844_s13 + $0x298] sm:$0xff]  ;;  %v3625_v42 = vpack.c.bf16 %v368_v44, %v361_v16  ;;  %v2553_v16 = vld [vmem:[%s4289_s1 + $0x2e8] sm:$0xf0] }
 0x112   : > { %v1153_v39 = vpop.f32.mrf.mxu1  ;;  %1564 = vmatpush.bf16.msrb.mxu2 %v2428_v45  ;;  %v3627_v31 = vpack.c.bf16 %v369_v6, %v362_v25 }
 0x113   : > { %v1249_v5 = vpop.f32.mrf.mxu3  ;;  %v1154_v34 = vadd.f32 %v1153_v39, %v3405_v63  ;;  %v2481_v63 = vld [vmem:[%s4289_s1 + $0x258] sm:$0xf0] }
 0x114   : > { %v1250_v21 = vadd.f32 %v1249_v5, %v1201_v50  ;;  %v2484_v45 = vor.u32 %v2681_v52, %v2481_v63  ;;  %v2663_v5 = vld [vmem:[%s4289_s1 + $0x1c4] sm:$0xf]  ;;  %4323 = vst [vmem:[#allocation15_spill] sm:$0xff] %v3627_v31  ;;  %v2473_v52 = vld [vmem:[%s4289_s1 + $0x248] sm:$0xf0] }
 0x115   : > { %1613 = vmatpush.bf16.msrb.mxu3 %v2492_v12  ;;  %v1300_v17 = vpop.f32.mrf.mxu0  ;;  %v2412_v39 = vor.u32 %v2663_v5, %v2409_v9  ;;  %v2699_v63 = vld [vmem:[%s4289_s1 + $0x2e4] sm:$0xf]  ;;  %v2313_v5 = vld [vmem:[%s4289_s1 + $0x108] sm:$0xf0] }
 0x116   : > { %v3603_v53 = vadd.f32 %v1298_v46, %v1250_v21  ;;  %1565 = vmatpush.bf16.msrb.mxu2 %v2420_v36  ;;  %v2561_v46 = vld [vmem:[%s4289_s1 + $0x2f8] sm:$0xf0]  ;;  %v2679_v36 = vld [vmem:[%s4289_s1 + $0x244] sm:$0xf]  ;;  %v2556_v6 = vor.u32 %v2699_v63, %v2553_v16 }
 0x117   : > { %v2564_v50 = vor.u32 %v2701_v40, %v2561_v46  ;;  %v2476_v25 = vor.u32 %v2679_v36, %v2473_v52  ;;  %v2401_v46 = vld [vmem:[%s4289_s1 + $0x1b8] sm:$0xf0] }
 0x118   : > { %v1202_v57 = vpop.f32.mrf.mxu2  ;;  %v2545_v36 = vld [vmem:[%s4289_s1 + $0x2d8] sm:$0xf0] }
 0x119   : > { %v1203_v12 = vadd.f32 %v1202_v57, %v1154_v34  ;;  %1614 = vmatpush.bf16.msrb.mxu3 %v2484_v45  ;;  %1661 = vmatpush.bf16.msrb.mxu0 %v2564_v50  ;;  %v2661_v45 = vld [vmem:[%s4289_s1 + $0x1b4] sm:$0xf] }
 0x11a   : > { %v1156_v34 = vpop.f32.mrf.mxu1  ;;  %1566 = vmatpush.bf16.msrb.mxu2 %v2412_v39  ;;  %v2404_v9 = vor.u32 %v2661_v45, %v2401_v46  ;;  %v2677_v57 = vld [vmem:[%s4289_s1 + $0x234] sm:$0xf]  ;;  %v2457_v46 = vld [vmem:[%s4289_s1 + $0x228] sm:$0xf0] }
 0x11b   : > { %v1251_v21 = vpop.f32.mrf.mxu3  ;;  %v1157_v44 = vadd.f32 %v1156_v34, %v3432_v48  ;;  %v2639_v48 = vld [vmem:[%s4289_s1 + $0x104] sm:$0xf]  ;;  %v2393_v34 = vld [vmem:[%s4289_s1 + $0x1a8] sm:$0xf0] }
 0x11c   : > { %v1252_v40 = vadd.f32 %v1251_v21, %v1203_v12  ;;  %v2316_v39 = vor.u32 %v2639_v48, %v2313_v5  ;;  %v2465_v12 = vld [vmem:[%s4289_s1 + $0x238] sm:$0xf0]  ;;  %v2697_v21 = vld [vmem:[%s4289_s1 + $0x2d4] sm:$0xf]  ;;  %v2695_v48 = vld [vmem:[%s4289_s1 + $0x2c4] sm:$0xf] }
 0x11d   : > { %1351 = vmatmul.bf16.gmra.mxu1 %v3625_v42  ;;  %2578 = vmatmul.msk.bf16.gmra.mxu2 %vm1048_vm0, %v3627_v31  ;;  %v2468_v52 = vor.u32 %v2677_v57, %v2465_v12  ;;  %v2548_v63 = vor.u32 %v2697_v21, %v2545_v36  ;;  %v2657_v12 = vld [vmem:[%s4289_s1 + $0x194] sm:$0xf]  ;;  %v2385_v21 = vld [vmem:[%s4289_s1 + $0x198] sm:$0xf0]  ;;  %v375_v36 = vld [vmem:[%s2844_s13 + $0x2c8] sm:$0xff] }
 0x11e   : > { %v3648_v50 = vadd.f32 %v1300_v17, %v1252_v40  ;;  %v1303_v17 = vpop.f32.mrf.mxu0  ;;  %1662 = vmatpush.bf16.msrb.mxu0 %v2556_v6  ;;  %1615 = vmatpush.bf16.msrb.mxu3 %v2476_v25  ;;  %v2675_v25 = vld [vmem:[%s4289_s1 + $0x224] sm:$0xf] }
 0x11f   : > { %1567 = vmatpush.bf16.msrb.mxu2 %v2404_v9  ;;  %1521 = vmatpush.bf16.msrb.mxu1 %v2316_v39 }
 0x120   : > { %1449 = vmatmul.bf16.gmra.mxu3 %v3009_v41  ;;  %v2659_v41 = vld [vmem:[%s4289_s1 + $0x1a4] sm:$0xf]  ;;  %v1205_v16 = vpop.f32.mrf.mxu2  ;;  %1498 = vmatmul.bf16.gmra.mxu0 %v3256_v19  ;;  %v2537_v19 = vld [vmem:[%s4289_s1 + $0x2c8] sm:$0xf0] }
 0x121   : > { %v2396_v40 = vor.u32 %v2659_v41, %v2393_v34  ;;  %v1206_v6 = vadd.f32 %v1205_v16, %v1157_v44  ;;  %v2460_v44 = vor.u32 %v2675_v25, %v2457_v46  ;;  %v2540_v39 = vor.u32 %v2695_v48, %v2537_v19  ;;  %v2693_v16 = vld [vmem:[%s4289_s1 + $0x2b4] sm:$0xf]  ;;  %v2655_v48 = vld [vmem:[%s4289_s1 + $0x184] sm:$0xf] }
 0x122   : > { %v1158_v5 = vpop.f32.mrf.mxu1  ;;  %1663 = vmatpush.bf16.msrb.mxu0 %v2548_v63  ;;  %1616 = vmatpush.bf16.msrb.mxu3 %v2468_v52  ;;  %v382_v63 = vld [vmem:[%s2844_s13 + $0x300] sm:$0xff]  ;;  %v2388_v41 = vor.u32 %v2657_v12, %v2385_v21  ;;  %v2449_v52 = vld [vmem:[%s4289_s1 + $0x218] sm:$0xf0] }
 0x123   : > { %v1254_v45 = vpop.f32.mrf.mxu3  ;;  %v1159_v9 = vadd.f32 %v1158_v5, %v3446_v30  ;;  %1568 = vmatpush.bf16.msrb.mxu2 %v2396_v40  ;;  %v2673_v30 = vld [vmem:[%s4289_s1 + $0x214] sm:$0xf]  ;;  %v2377_v5 = vld [vmem:[%s4289_s1 + $0x188] sm:$0xf0]  ;;  %v3722_v21 = vpack.c.bf16 %v382_v63, %v375_v36 }
 0x124   : > { %v1255_v57 = vadd.f32 %v1254_v45, %v1206_v6  ;;  %v376_v6 = vld [vmem:[%s2844_s13 + $0x2d0] sm:$0xff]  ;;  %v383_v45 = vld [vmem:[%s2844_s13 + $0x308] sm:$0xff]  ;;  %v2452_v25 = vor.u32 %v2673_v30, %v2449_v52  ;;  %v2691_v30 = vld [vmem:[%s4289_s1 + $0x2a4] sm:$0xf] }
 0x125   : > { %v3724_v31 = vpack.c.bf16 %v383_v45, %v376_v6  ;;  %v2521_v36 = vld [vmem:[%s4289_s1 + $0x2a8] sm:$0xf0] }
 0x126   : > { %v3700_v34 = vadd.f32 %v1303_v17, %v1255_v57  ;;  %v1305_v40 = vpop.f32.mrf.mxu0  ;;  %1664 = vmatpush.bf16.msrb.mxu0 %v2540_v39  ;;  %v2529_v17 = vld [vmem:[%s4289_s1 + $0x2b8] sm:$0xf0]  ;;  %1617 = vmatpush.bf16.msrb.mxu3 %v2460_v44  ;;  %v2380_v57 = vor.u32 %v2655_v48, %v2377_v5  ;;  %v2671_v44 = vld [vmem:[%s4289_s1 + $0x204] sm:$0xf]  ;;  %v2524_v6 = vor.u32 %v2691_v30, %v2521_v36 }
 0x127   : > { %1569 = vmatpush.bf16.msrb.mxu2 %v2388_v41  ;;  %v2532_v46 = vor.u32 %v2693_v16, %v2529_v17  ;;  %v2441_v41 = vld [vmem:[%s4289_s1 + $0x208] sm:$0xf0]  ;;  %v2703_v17 = vld [vmem:[%s4289_s1 + $0x304] sm:$0xf]  ;;  %v2513_v48 = vld [vmem:[%s4289_s1 + $0x298] sm:$0xf0] }
 0x128   : > { %v1207_v19 = vpop.f32.mrf.mxu2  ;;  %v389_v36 = vld [vmem:[%s2844_s13 + $0x338] sm:$0xff] }
 0x129   : > { %v1208_v12 = vadd.f32 %v1207_v19, %v1159_v9  ;;  %v2444_v9 = vor.u32 %v2671_v44, %v2441_v41 }
 0x12a   : > { %v1161_v52 = vpop.f32.mrf.mxu1  ;;  %1665 = vmatpush.bf16.msrb.mxu0 %v2532_v46  ;;  %1618 = vmatpush.bf16.msrb.mxu3 %v2452_v25  ;;  %v2569_v46 = vld [vmem:[%s4289_s1 + $0x308] sm:$0xf0] }
 0x12b   : > { %v1256_v39 = vpop.f32.mrf.mxu3  ;;  %v1162_v63 = vadd.f32 %v1161_v52, %v3396_v27  ;;  %1570 = vmatpush.bf16.msrb.mxu2 %v2380_v57  ;;  %v2689_v27 = vld [vmem:[%s4289_s1 + $0x294] sm:$0xf]  ;;  %v2572_v25 = vor.u32 %v2703_v17, %v2569_v46 }
 0x12c   : > { %v1257_v16 = vadd.f32 %v1256_v39, %v1208_v12  ;;  %v2516_v5 = vor.u32 %v2689_v27, %v2513_v48  ;;  %v2505_v39 = vld [vmem:[%s4289_s1 + $0x288] sm:$0xf0] }
 0x12d   : > { %1356 = vmatmul.bf16.gmra.mxu1 %v3722_v21  ;;  %2579 = vmatmul.msk.bf16.gmra.mxu2 %vm1048_vm0, %v3724_v31 }
 0x12e   : > { %v3739_v45 = vadd.f32 %v1305_v40, %v1257_v16  ;;  %v1308_v40 = vpop.f32.mrf.mxu0  ;;  %1666 = vmatpush.bf16.msrb.mxu0 %v2524_v6  ;;  %1619 = vmatpush.bf16.msrb.mxu3 %v2444_v9  ;;  %v396_v16 = vld [vmem:[%s2844_s13 + $0x370] sm:$0xff]  ;;  %v397_v6 = vld [vmem:[%s2844_s13 + $0x378] sm:$0xff] }
 0x12f   : > { %1717 = vmatpush.bf16.msra.mxu1 %v2572_v25  ;;  %v3771_v25 = vpack.c.bf16 %v396_v16, %v389_v36 }
 0x130   : > { %1454 = vmatmul.bf16.gmra.mxu3 %v2904_v49  ;;  %v1210_v19 = vpop.f32.mrf.mxu2  ;;  %1503 = vmatmul.bf16.gmra.mxu0 %v3336_v35  ;;  %v2687_v49 = vld [vmem:[%s4289_s1 + $0x284] sm:$0xf] }
 0x131   : > { %v1211_v57 = vadd.f32 %v1210_v19, %v1162_v63  ;;  %v2508_v41 = vor.u32 %v2687_v49, %v2505_v39  ;;  %v390_v35 = vld [vmem:[%s2844_s13 + $0x340] sm:$0xff] }
 0x132   : > { %v1163_v44 = vpop.f32.mrf.mxu1  ;;  %1667 = vmatpush.bf16.msrb.mxu0 %v2516_v5  ;;  %v3773_v48 = vpack.c.bf16 %v397_v6, %v390_v35 }
 0x133   : > { %v1259_v12 = vpop.f32.mrf.mxu3  ;;  %v1164_v30 = vadd.f32 %v1163_v44, %v3414_v10 }
 0x134   : > { %v1260_v52 = vadd.f32 %v1259_v12, %v1211_v57 }
 0x136   : > { %v3765_v9 = vadd.f32 %v1308_v40, %v1260_v52  ;;  %v1310_v63 = vpop.f32.mrf.mxu0  ;;  %1668 = vmatpush.bf16.msrb.mxu0 %v2508_v41 }
 0x138   : > { %v1212_v17 = vpop.f32.mrf.mxu2 }
 0x139   : > { %v1213_v46 = vadd.f32 %v1212_v17, %v1164_v30 }
 0x13a   : > { %v1166_v5 = vpop.f32.mrf.mxu1 }
 0x13b   : > { %v1261_v27 = vpop.f32.mrf.mxu3  ;;  %v1167_v19 = vadd.f32 %v1166_v5, %v3438_v59 }
 0x13c   : > { %v1262_v10 = vadd.f32 %v1261_v27, %v1213_v46 }
 0x13d   : > { %1361 = vmatmul.bf16.gmra.mxu1 %v3771_v25  ;;  %2580 = vmatmul.msk.bf16.gmra.mxu2 %vm1048_vm0, %v3773_v48 }
 0x13e   : > { %v3776_v57 = vadd.f32 %v1310_v63, %v1262_v10  ;;  %v1313_v40 = vpop.f32.mrf.mxu0 }
 0x140   : > { %1459 = vmatmul.bf16.gmra.mxu3 %v3020_v47  ;;  %v1215_v12 = vpop.f32.mrf.mxu2  ;;  %1508 = vmatmul.bf16.gmra.mxu0 %v3407_v3 }
 0x141   : > { %v1216_v49 = vadd.f32 %v1215_v12, %v1167_v19 }
 0x142   : > { %v1168_v44 = vpop.f32.mrf.mxu1 }
 0x143   : > { %v1264_v39 = vpop.f32.mrf.mxu3  ;;  %v1169_v41 = vadd.f32 %v1168_v44, %v3453_v2  ;;  %v3793_v2 = vperm.slane %v3361_v1, 1 }
 0x144   : > { %v1265_v59 = vadd.f32 %v1264_v39, %v1216_v49 }
 0x146   : > { %v3784_v30 = vadd.f32 %v1313_v40, %v1265_v59  ;;  %v1315_v52 = vpop.f32.mrf.mxu0 }
 0x148   : > { %v1217_v36 = vpop.f32.mrf.mxu2 }
 0x149   : > { %v1218_v63 = vadd.f32 %v1217_v36, %v1169_v41 }
 0x14a   : > { %v1327_v35 = vpop.f32.mrf.mxu1 }
 0x14b   : > { %v1266_v16 = vpop.f32.mrf.mxu3  ;;  %v1328_v47 = vadd.f32 %v1327_v35, %v3467_v38 }
 0x14c   : > { %v1267_v6 = vadd.f32 %v1266_v16, %v1218_v63 }
 0x14d   : > { %1522 = vmatmul.bf16.vlgmr.msrb.gmra.mxu1 %v3104_v32  ;;  %1571 = vmatmul.bf16.vlgmr.msrb.gmra.mxu2 %v3106_v33 }
 0x14e   : > { %v3787_v17 = vadd.f32 %v1315_v52, %v1267_v6  ;;  %v1474_v3 = vpop.f32.mrf.mxu0 }
 0x150   : > { %1620 = vmatmul.bf16.vlgmr.msrb.gmra.mxu3 %v3112_v37  ;;  %v1376_v46 = vpop.f32.mrf.mxu2  ;;  %1669 = vmatmul.bf16.vlgmr.msrb.gmra.mxu0 %v3448_v4 }
 0x151   : > { %v3795_v27 = vadd.f32 %v1376_v46, %v1328_v47 }
 0x152   : > { %v1329_v19 = vpop.f32.mrf.mxu1 }
 0x153   : > { %v1425_v5 = vpop.f32.mrf.mxu3  ;;  %v1330_v10 = vadd.f32 %v1329_v19, %v3478_v24 }
 0x154   : > { %v1426_v38 = vadd.f32 %v1425_v5, %v3793_v2 }
 0x156   : > { %v3800_v32 = vadd.f32 %v1474_v3, %v1426_v38  ;;  %v1476_v33 = vpop.f32.mrf.mxu0 }
 0x158   : > { %v1378_v40 = vpop.f32.mrf.mxu2 }
 0x159   : > { %v3802_v37 = vadd.f32 %v1378_v40, %v1330_v10 }
 0x15a   : > { %v1332_v12 = vpop.f32.mrf.mxu1 }
 0x15b   : > { %v1427_v1 = vpop.f32.mrf.mxu3  ;;  %v1333_v39 = vadd.f32 %v1332_v12, %v3492_v62 }
 0x15c   : > { %v1428_v49 = vadd.f32 %v1427_v1, %v3793_v2 }
 0x15d   : > { %1527 = vmatmul.bf16.gmra.mxu1 %v3130_v54  ;;  %1576 = vmatmul.bf16.gmra.mxu2 %v3132_v55 }
 0x15e   : > { %v3806_v44 = vadd.f32 %v1476_v33, %v1428_v49  ;;  %v1479_v4 = vpop.f32.mrf.mxu0 }
 0x160   : > { %1625 = vmatmul.bf16.gmra.mxu3 %v3138_v58  ;;  %v1381_v24 = vpop.f32.mrf.mxu2  ;;  %1674 = vmatmul.bf16.gmra.mxu0 %v3474_v14 }
 0x161   : > { %v3811_v41 = vadd.f32 %v1381_v24, %v1333_v39 }
 0x162   : > { %v1334_v52 = vpop.f32.mrf.mxu1 }
 0x163   : > { %v1430_v59 = vpop.f32.mrf.mxu3  ;;  %v1335_v62 = vadd.f32 %v1334_v52, %v3504_v43 }
 0x164   : > { %v1431_v36 = vadd.f32 %v1430_v59, %v3793_v2 }
 0x166   : > { %v3816_v63 = vadd.f32 %v1479_v4, %v1431_v36  ;;  %v1481_v16 = vpop.f32.mrf.mxu0 }
 0x168   : > { %v1383_v54 = vpop.f32.mrf.mxu2 }
 0x169   : > { %v3818_v35 = vadd.f32 %v1383_v54, %v1335_v62 }
 0x16a   : > { %v1337_v58 = vpop.f32.mrf.mxu1 }
 0x16b   : > { %v1432_v55 = vpop.f32.mrf.mxu3  ;;  %v1338_v47 = vadd.f32 %v1337_v58, %v3519_v15  ;;  %v4325_v58 = vld [vmem:[#allocation3_spill] sm:$0xff] }
 0x16c   : > { %v1433_v6 = vadd.f32 %v1432_v55, %v3793_v2 }
 0x16d   : > { %1532 = vmatmul.bf16.gmra.mxu1 %v3156_v7  ;;  %1581 = vmatmul.bf16.gmra.mxu2 %v3158_v8 }
 0x16e   : > { %v3822_v3 = vadd.f32 %v1481_v16, %v1433_v6  ;;  %v1484_v14 = vpop.f32.mrf.mxu0  ;;  %v4326_v6 = vld [vmem:[#allocation4_spill] sm:$0xff] }
 0x170   : > { %1630 = vmatmul.bf16.gmra.mxu3 %v3164_v11  ;;  %v1386_v43 = vpop.f32.mrf.mxu2  ;;  %1679 = vmatmul.bf16.gmra.mxu0 %v3500_v18 }
 0x171   : > { %v3827_v46 = vadd.f32 %v1386_v43, %v1338_v47  ;;  %v1805_v47 = vld [vmem:[%s4291_s3 + $0x70] sm:$0xff] }
 0x172   : > { %v1339_v19 = vpop.f32.mrf.mxu1 }
 0x173   : > { %v1435_v5 = vpop.f32.mrf.mxu3  ;;  %v1340_v15 = vadd.f32 %v1339_v19, %v3531_v29  ;;  %v1802_v19 = vld [vmem:[%s4291_s3 + $0x58] sm:$0xff] }
 0x174   : > { %v1436_v38 = vadd.f32 %v1435_v5, %v3793_v2  ;;  %v1803_v5 = vld [vmem:[%s4291_s3 + $0x60] sm:$0xff] }
 0x176   : > { %v3832_v10 = vadd.f32 %v1484_v14, %v1436_v38  ;;  %v1486_v33 = vpop.f32.mrf.mxu0 }
 0x178   : > { %v1388_v7 = vpop.f32.mrf.mxu2 }
 0x179   : > { %v3834_v40 = vadd.f32 %v1388_v7, %v1340_v15  ;;  %v4327_v7 = vld [vmem:[#allocation5_spill] sm:$0xff] }
 0x17a   : > { %v1342_v11 = vpop.f32.mrf.mxu1 }
 0x17b   : > { %v1437_v8 = vpop.f32.mrf.mxu3  ;;  %v1343_v12 = vadd.f32 %v1342_v11, %v3546_v28  ;;  %v1798_v11 = vld [vmem:[%s4291_s3 + $0x38] sm:$0xff] }
 0x17c   : > { %v1438_v1 = vadd.f32 %v1437_v8, %v3793_v2  ;;  %v4328_v8 = vld [vmem:[#allocation6_spill] sm:$0xff] }
 0x17d   : > { %1537 = vmatmul.bf16.gmra.mxu1 %v3182_v22  ;;  %1586 = vmatmul.bf16.gmra.mxu2 %v3184_v23 }
 0x17e   : > { %v3838_v49 = vadd.f32 %v1486_v33, %v1438_v1  ;;  %v1489_v4 = vpop.f32.mrf.mxu0  ;;  %v1799_v33 = vld [vmem:[%s4291_s3 + $0x40] sm:$0xff]  ;;  %v4329_v1 = vld [vmem:[#allocation7_spill] sm:$0xff] }
 0x180   : > { %1635 = vmatmul.bf16.gmra.mxu3 %v3190_v26  ;;  %v1391_v18 = vpop.f32.mrf.mxu2  ;;  %1684 = vmatmul.bf16.gmra.mxu0 %v3527_v20  ;;  %v4324_v20 = vld [vmem:[#allocation2_spill] sm:$0xff] }
 0x181   : > { %v3843_v29 = vadd.f32 %v1391_v18, %v1343_v12  ;;  %v1796_v12 = vld [vmem:[%s4291_s3 + $0x28] sm:$0xff] }
 0x182   : > { %v1344_v24 = vpop.f32.mrf.mxu1 }
 0x183   : > { %v1440_v39 = vpop.f32.mrf.mxu3  ;;  %v1345_v28 = vadd.f32 %v1344_v24, %v3563_v0  ;;  %v1806_v0 = vld [vmem:[%s4291_s3 + $0x78] sm:$0xff] }
 0x184   : > { %v1441_v59 = vadd.f32 %v1440_v39, %v3793_v2  ;;  %1827 = vmatpush.msra.mxu2 %v1806_v0  ;;  %v1794_v24 = vld [vmem:[%s4291_s3 + $0x18] sm:$0xff]  ;;  %v1821_v0 = vld [vmem:[%s4291_s3 + $0xf0] sm:$0xff] }
 0x186   : > { %v3848_v52 = vadd.f32 %v1489_v4, %v1441_v59  ;;  %v1491_v54 = vpop.f32.mrf.mxu0  ;;  %1828 = vmatpush.msra.mxu2 %v1805_v47  ;;  %v1795_v4 = vld [vmem:[%s4291_s3 + $0x20] sm:$0xff] }
 0x188   : > { %v1393_v36 = vpop.f32.mrf.mxu2 }
 0x189   : > { %v3850_v22 = vadd.f32 %v1393_v36, %v1345_v28  ;;  %v1791_v36 = vld [vmem:[%s4291_s3] sm:$0xff] }
 0x18a   : > { %v1347_v62 = vpop.f32.mrf.mxu1 }
 0x18b   : > { %v1442_v23 = vpop.f32.mrf.mxu3  ;;  %v3854_v16 = vadd.f32 %v1347_v62, %v3603_v53  ;;  %v1804_v53 = vld [vmem:[%s4291_s3 + $0x68] sm:$0xff]  ;;  %v4331_v62 = vld [vmem:[#allocation9_spill] sm:$0xff] }
 0x18c   : > { %v1443_v26 = vadd.f32 %v1442_v23, %v3793_v2  ;;  %1829 = vmatpush.msra.mxu2 %v1804_v53  ;;  %v4330_v23 = vld [vmem:[#allocation8_spill] sm:$0xff] }
 0x18d   : > { %1542 = vmatmul.bf16.gmra.mxu1 %v4324_v20  ;;  %1591 = vmatmul.bf16.gmra.mxu2 %v4325_v58 }
 0x18e   : > { %v3856_v55 = vadd.f32 %v1491_v54, %v1443_v26  ;;  %1830 = vmatpush.msra.mxu2 %v1803_v5  ;;  %v1822_v26 = vld [vmem:[%s4291_s3 + $0xf8] sm:$0xff]  ;;  %v4332_v54 = vld [vmem:[#allocation10_spill] sm:$0xff]  ;;  %v4334_v5 = vld [vmem:[#allocation12_spill] sm:$0xff] }
 0x18f   : > { %1892 = vmatpush.msra.mxu3 %v1822_v26  ;;  %v1767_v26 = vmax.f32 %v3827_v46, 0.0  ;;  %v1769_v46 = vmax.f32 %v3834_v40, 0.0 }
 0x190   : > { %1640 = vmatmul.bf16.gmra.mxu3 %v4326_v6  ;;  %1689 = vmatmul.bf16.gmra.mxu0 %v3552_v61  ;;  %v1801_v61 = vld [vmem:[%s4291_s3 + $0x50] sm:$0xff]  ;;  %v3932_v20 = vpop.f32.mrf.mxu2 }
 0x191   : > { %1831 = vmatpush.msra.mxu2 %v1802_v19  ;;  %1893 = vmatpush.msra.mxu3 %v1821_v0 }
 0x192   : > { %v1349_v14 = vpop.f32.mrf.mxu1 }
 0x193   : > { %v3872_v43 = vadd.f32 %v1349_v14, %v3648_v50  ;;  %1832 = vmatpush.msra.mxu2 %v1801_v61  ;;  %v1800_v50 = vld [vmem:[%s4291_s3 + $0x48] sm:$0xff] }
 0x194   : > { %v4333_v14 = vld [vmem:[#allocation11_spill] sm:$0xff] }
 0x195   : > { %1833 = vmatpush.msra.mxu2 %v1800_v50 }
 0x197   : > { %1834 = vmatpush.msra.mxu2 %v1799_v33  ;;  %v1759_v33 = vmax.f32 %v3795_v27, 0.0 }
 0x198   : > { %v3941_v6 = vpop.f32.mrf.mxu2 }
 0x199   : > { %1835 = vmatpush.msra.mxu2 %v1798_v11 }
 0x19a   : > { %v1352_v38 = vpop.f32.mrf.mxu1 }
 0x19b   : > { %v3887_v15 = vadd.f32 %v1352_v38, %v3700_v34  ;;  %v1797_v34 = vld [vmem:[%s4291_s3 + $0x30] sm:$0xff] }
 0x19c   : > { %1836 = vmatpush.msra.mxu2 %v1797_v34  ;;  %v3973_v34 = vpop.f32.mrf.mxu3 }
 0x19d   : > { %1547 = vmatmul.bf16.gmra.mxu1 %v4327_v7  ;;  %1596 = vmatmul.bf16.gmra.mxu2 %v4328_v8 }
 0x19e   : > { %1837 = vmatpush.msra.mxu2 %v1796_v12 }
 0x1a0   : > { %1645 = vmatmul.bf16.gmra.mxu3 %v4329_v1  ;;  %1694 = vmatmul.bf16.gmra.mxu0 %v3625_v42  ;;  %v1793_v42 = vld [vmem:[%s4291_s3 + $0x10] sm:$0xff]  ;;  %v3953_v61 = vpop.f32.mrf.mxu2  ;;  %v1761_v1 = vmax.f32 %v3802_v37, 0.0 }
 0x1a1   : > { %1838 = vmatpush.msra.mxu2 %v1795_v4 }
 0x1a2   : > { %v1354_v18 = vpop.f32.mrf.mxu1 }
 0x1a3   : > { %v3906_v39 = vadd.f32 %v1354_v18, %v3739_v45  ;;  %1839 = vmatpush.msra.mxu2 %v1794_v24  ;;  %v1792_v45 = vld [vmem:[%s4291_s3 + $0x8] sm:$0xff]  ;;  %v3983_v18 = vpop.f32.mrf.mxu0  ;;  %v1763_v24 = vmax.f32 %v3811_v41, 0.0  ;;  %v1765_v41 = vmax.f32 %v3818_v35, 0.0 }
 0x1a5   : > { %1840 = vmatpush.msra.mxu2 %v1793_v42  ;;  %v3989_v42 = vpop.f32.mrf.mxu3 }
 0x1a7   : > { %1841 = vmatpush.msra.mxu2 %v1792_v45 }
 0x1a8   : > { %v3965_v8 = vpop.f32.mrf.mxu2 }
 0x1a9   : > { %1842 = vmatpush.msra.mxu2 %v1791_v36 }
 0x1aa   : > { %v1357_v59 = vpop.f32.mrf.mxu1 }
 0x1ab   : > { %v3921_v28 = vadd.f32 %v1357_v59, %v3765_v9  ;;  %v3998_v59 = vpop.f32.mrf.mxu0 }
 0x1ad   : > { %1552 = vmatmul.bf16.gmra.mxu1 %v4330_v23  ;;  %1601 = vmatmul.bf16.gmra.mxu2 %v4331_v62  ;;  %v4007_v23 = vpop.f32.mrf.mxu3 }
 0x1b0   : > { %1650 = vmatmul.bf16.gmra.mxu3 %v4332_v54  ;;  %1699 = vmatmul.bf16.gmra.mxu0 %v3722_v21  ;;  %v1820_v21 = vld [vmem:[%s4291_s3 + $0xe8] sm:$0xff]  ;;  %v3981_v12 = vpop.f32.mrf.mxu2 }
 0x1b1   : > { %1894 = vmatpush.msra.mxu3 %v1820_v21 }
 0x1b2   : > { %v1359_v9 = vpop.f32.mrf.mxu1 }
 0x1b3   : > { %v3936_v58 = vadd.f32 %v1359_v9, %v3776_v57  ;;  %v4335_v57 = vld [vmem:[#allocation13_spill] sm:$0xff]  ;;  %v4015_v35 = vpop.f32.mrf.mxu0 }
 0x1b5   : > { %v4022_v0 = vpop.f32.mrf.mxu3 }
 0x1b8   : > { %v3996_v45 = vpop.f32.mrf.mxu2 }
 0x1ba   : > { %v1362_v47 = vpop.f32.mrf.mxu1 }
 0x1bb   : > { %v3944_v53 = vadd.f32 %v1362_v47, %v3784_v30  ;;  %v1819_v30 = vld [vmem:[%s4291_s3 + $0xe0] sm:$0xff] }
 0x1bc   : > { %1895 = vmatpush.msra.mxu3 %v1819_v30 }
 0x1bd   : > { %1557 = vmatmul.bf16.gmra.mxu1 %v4333_v14  ;;  %1606 = vmatmul.bf16.gmra.mxu2 %v4334_v5  ;;  %v4033_v5 = vpop.f32.mrf.mxu0 }
 0x1c0   : > { %1655 = vmatmul.bf16.gmra.mxu3 %v4335_v57  ;;  %1704 = vmatmul.bf16.gmra.mxu0 %v3771_v25  ;;  %v4336_v25 = vld [vmem:[#allocation14_spill] sm:$0xff]  ;;  %v4010_v54 = vpop.f32.mrf.mxu2  ;;  %v1771_v57 = vmax.f32 %v3843_v29, 0.0  ;;  %v1773_v29 = vmax.f32 %v3850_v22, 0.0 }
 0x1c2   : > { %v1364_v19 = vpop.f32.mrf.mxu1 }
 0x1c3   : > { %v3956_v50 = vadd.f32 %v1364_v19, %v3787_v17  ;;  %v1818_v17 = vld [vmem:[%s4291_s3 + $0xd8] sm:$0xff]  ;;  %v4036_v19 = vpop.f32.mrf.mxu3 }
 0x1c4   : > { %1896 = vmatpush.msra.mxu3 %v1818_v17  ;;  %v1397_v17 = vadd.f32 %v3932_v20, %v3854_v16 }
 0x1c6   : > { %v1775_v22 = vmax.f32 %v1397_v17, 0.0 }
 0x1ca   : > { %v1523_v38 = vpop.f32.mrf.mxu1 }
 0x1cb   : > { %v3963_v7 = vadd.f32 %v1523_v38, %v3800_v32  ;;  %v1817_v32 = vld [vmem:[%s4291_s3 + $0xd0] sm:$0xff]  ;;  %v4048_v38 = vpop.f32.mrf.mxu0 }
 0x1cc   : > { %1897 = vmatpush.msra.mxu3 %v1817_v32 }
 0x1cd   : > { %2581 = vmatmul.msk.bf16.vlgmr.msra.gmra.mxu1 %vm1048_vm0, %v4336_v25  ;;  %1843 = vmatmul.f32.vlgmr.msra.gmra.mxu2 %v1759_v33 }
 0x1d2   : > { %v1525_v11 = vpop.f32.mrf.mxu1 }
 0x1d3   : > { %v3976_v27 = vadd.f32 %v1525_v11, %v3806_v44  ;;  %v1816_v44 = vld [vmem:[%s4291_s3 + $0xc8] sm:$0xff] }
 0x1d4   : > { %1898 = vmatpush.msra.mxu3 %v1816_v44 }
 0x1d5   : > { %1846 = vmatmul.f32.gmra.mxu2 %v1761_v1  ;;  %v4063_v1 = vpop.f32.mrf.mxu0 }
 0x1da   : > { %v1528_v4 = vpop.f32.mrf.mxu1 }
 0x1db   : > { %v3987_v37 = vadd.f32 %v1528_v4, %v3816_v63  ;;  %v1399_v4 = vadd.f32 %v3941_v6, %v3872_v43 }
 0x1dd   : > { %2582 = vmatmul.msk.bf16.gmra.mxu1 %vm1048_vm0, %v3476_v56  ;;  %1849 = vmatmul.f32.gmra.mxu2 %v1763_v24  ;;  %v1815_v56 = vld [vmem:[%s4291_s3 + $0xc0] sm:$0xff]  ;;  %v1777_v24 = vmax.f32 %v1399_v4, 0.0 }
 0x1de   : > { %1899 = vmatpush.msra.mxu3 %v1815_v56 }
 0x1e2   : > { %v1530_v36 = vpop.f32.mrf.mxu1 }
 0x1e3   : > { %v4002_v63 = vadd.f32 %v1530_v36, %v3822_v3  ;;  %v1814_v3 = vld [vmem:[%s4291_s3 + $0xb8] sm:$0xff]  ;;  %v4080_v36 = vpop.f32.mrf.mxu0 }
 0x1e4   : > { %1900 = vmatpush.msra.mxu3 %v1814_v3  ;;  %v1808_v3 = vld [vmem:[%s4291_s3 + $0x88] sm:$0xff] }
 0x1e5   : > { %1852 = vmatmul.f32.gmra.mxu2 %v1765_v41  ;;  %v1402_v41 = vadd.f32 %v3953_v61, %v3887_v15  ;;  %v1404_v15 = vadd.f32 %v3965_v8, %v3906_v39  ;;  %v1409_v8 = vadd.f32 %v3996_v45, %v3936_v58 }
 0x1e7   : > { %v1779_v6 = vmax.f32 %v1402_v41, 0.0 }
 0x1ea   : > { %v1533_v62 = vpop.f32.mrf.mxu1 }
 0x1eb   : > { %v4013_v9 = vadd.f32 %v1533_v62, %v3832_v10  ;;  %v4028_v10 = vpop.f32.mrf.mxu2 }
 0x1ec   : > { %v1414_v41 = vadd.f32 %v4028_v10, %v3956_v50 }
 0x1ed   : > { %2583 = vmatmul.msk.bf16.gmra.mxu1 %vm1048_vm0, %v3502_v51  ;;  %1855 = vmatmul.f32.gmra.mxu2 %v1767_v26  ;;  %v1813_v51 = vld [vmem:[%s4291_s3 + $0xb0] sm:$0xff]  ;;  %v4337_v26 = vld [vmem:[#allocation15_spill] sm:$0xff] }
 0x1ee   : > { %1901 = vmatpush.msra.mxu3 %v1813_v51 }
 0x1f2   : > { %v1535_v47 = vpop.f32.mrf.mxu1 }
 0x1f3   : > { %v4026_v14 = vadd.f32 %v1535_v47, %v3838_v49  ;;  %v1812_v49 = vld [vmem:[%s4291_s3 + $0xa8] sm:$0xff]  ;;  %v4046_v30 = vpop.f32.mrf.mxu2  ;;  %v4098_v47 = vpop.f32.mrf.mxu0 }
 0x1f4   : > { %1902 = vmatpush.msra.mxu3 %v1812_v49 }
 0x1f5   : > { %1858 = vmatmul.f32.gmra.mxu2 %v1769_v46  ;;  %v1781_v46 = vmax.f32 %v1404_v15, 0.0 }
 0x1fa   : > { %v1538_v21 = vpop.f32.mrf.mxu1 }
 0x1fb   : > { %v4039_v40 = vadd.f32 %v1538_v21, %v3848_v52  ;;  %v4054_v52 = vpop.f32.mrf.mxu3  ;;  %v4061_v11 = vpop.f32.mrf.mxu2  ;;  %v1807_v21 = vld [vmem:[%s4291_s3 + $0x80] sm:$0xff] }
 0x1fc   : > { %v1575_v50 = vadd.f32 %v4061_v11, %v3976_v27  ;;  %v1978_v27 = vld [vmem:[%s4293_s5 + $0x28] sm:$0xff] }
 0x1fd   : > { %2584 = vmatmul.msk.bf16.gmra.mxu1 %vm1048_vm0, %v3529_v60  ;;  %1861 = vmatmul.f32.gmra.mxu2 %v1771_v57  ;;  %v1811_v60 = vld [vmem:[%s4291_s3 + $0xa0] sm:$0xff]  ;;  %v1407_v57 = vadd.f32 %v3981_v12, %v3921_v28  ;;  %v1785_v28 = vmax.f32 %v1409_v8, 0.0  ;;  %v1412_v12 = vadd.f32 %v4010_v54, %v3944_v53  ;;  %v1573_v53 = vadd.f32 %v4046_v30, %v3963_v7 }
 0x1fe   : > { %1903 = vmatpush.msra.mxu3 %v1811_v60 }
 0x1ff   : > { %v1783_v60 = vmax.f32 %v1407_v57, 0.0 }
 0x202   : > { %v1540_v33 = vpop.f32.mrf.mxu1 }
 0x203   : > { %v4052_v25 = vadd.f32 %v1540_v33, %v3856_v55  ;;  %v1810_v55 = vld [vmem:[%s4291_s3 + $0x98] sm:$0xff]  ;;  %v4074_v16 = vpop.f32.mrf.mxu3  ;;  %v4078_v44 = vpop.f32.mrf.mxu2 }
 0x204   : > { %1904 = vmatpush.msra.mxu3 %v1810_v55  ;;  %v1670_v33 = vpop.f32.mrf.mxu0 }
 0x205   : > { %1864 = vmatmul.f32.gmra.mxu2 %v1773_v29 }
 0x20a   : > { %v4065_v32 = vpop.f32.mrf.mxu1 }
 0x20b   : > { %v4087_v56 = vpop.f32.mrf.mxu3  ;;  %v4091_v62 = vpop.f32.mrf.mxu2 }
 0x20d   : > { %2585 = vmatmul.msk.bf16.gmra.mxu1 %vm1048_vm0, %v3554_v13  ;;  %1867 = vmatmul.f32.gmra.mxu2 %v1775_v22  ;;  %v1809_v13 = vld [vmem:[%s4291_s3 + $0x90] sm:$0xff]  ;;  %v1672_v22 = vpop.f32.mrf.mxu0 }
 0x20e   : > { %1905 = vmatpush.msra.mxu3 %v1809_v13  ;;  %v1787_v13 = vmax.f32 %v1412_v12, 0.0 }
 0x210   : > { %1906 = vmatpush.msra.mxu3 %v1808_v3 }
 0x212   : > { %v4076_v20 = vpop.f32.mrf.mxu1  ;;  %1907 = vmatpush.msra.mxu3 %v1807_v21 }
 0x213   : > { %v1621_v51 = vpop.f32.mrf.mxu3  ;;  %v4109_v49 = vpop.f32.mrf.mxu2 }
 0x214   : > { %v1622_v3 = vadd.f32 %v1621_v51, %v1573_v53 }
 0x215   : > { %1870 = vmatmul.f32.gmra.mxu2 %v1777_v24  ;;  %v1980_v24 = vld [vmem:[%s4293_s5 + $0x38] sm:$0xff]  ;;  %v1675_v45 = vpop.f32.mrf.mxu0 }
 0x216   : > { %2042 = vmatpush.msra.mxu0 %v1980_v24  ;;  %v1671_v21 = vadd.f32 %v1670_v33, %v1622_v3  ;;  %v1580_v33 = vadd.f32 %v4091_v62, %v4002_v63  ;;  %v1977_v63 = vld [vmem:[%s4293_s5 + $0x20] sm:$0xff] }
 0x21a   : > { %v4089_v43 = vpop.f32.mrf.mxu1 }
 0x21b   : > { %v1623_v39 = vpop.f32.mrf.mxu3  ;;  %v4117_v17 = vpop.f32.mrf.mxu2 }
 0x21c   : > { %v1624_v57 = vadd.f32 %v1623_v39, %v1575_v50 }
 0x21d   : > { %2586 = vmatmul.msk.bf16.gmra.mxu1 %vm1048_vm0, %v4337_v26  ;;  %1873 = vmatmul.f32.gmra.mxu2 %v1779_v6  ;;  %v1789_v26 = vmax.f32 %v1414_v41, 0.0 }
 0x21e   : > { %v1673_v8 = vadd.f32 %v1672_v22, %v1624_v57 }
 0x222   : > { %v4102_v61 = vpop.f32.mrf.mxu1 }
 0x223   : > { %v1626_v4 = vpop.f32.mrf.mxu3  ;;  %v4128_v58 = vpop.f32.mrf.mxu2 }
 0x225   : > { %1876 = vmatmul.f32.gmra.mxu2 %v1781_v46  ;;  %v1677_v46 = vpop.f32.mrf.mxu0 }
 0x22a   : > { %v4111_v29 = vpop.f32.mrf.mxu1 }
 0x22b   : > { %v1628_v54 = vpop.f32.mrf.mxu3  ;;  %v4138_v15 = vpop.f32.mrf.mxu2 }
 0x22c   : > { %v1629_v3 = vadd.f32 %v1628_v54, %v1580_v33  ;;  %v1585_v54 = vadd.f32 %v4117_v17, %v4026_v14  ;;  %v1446_v14 = vadd.f32 %v3973_v34, %v3793_v2  ;;  %v1976_v17 = vld [vmem:[%s4293_s5 + $0x18] sm:$0xff] }
 0x22d   : > { %2587 = vmatmul.msk.bf16.gmra.mxu1 %vm1048_vm0, %v3724_v31  ;;  %1879 = vmatmul.f32.gmra.mxu2 %v1783_v60  ;;  %v1680_v51 = vpop.f32.mrf.mxu0 }
 0x232   : > { %v4119_v55 = vpop.f32.mrf.mxu1 }
 0x233   : > { %v1631_v7 = vpop.f32.mrf.mxu3 }
 0x235   : > { %1882 = vmatmul.f32.gmra.mxu2 %v1785_v28  ;;  %v1578_v28 = vadd.f32 %v4078_v44, %v3987_v37  ;;  %v1682_v39 = vpop.f32.mrf.mxu0 }
 0x23a   : > { %v4126_v31 = vpop.f32.mrf.mxu1 }
 0x23b   : > { %v1633_v41 = vpop.f32.mrf.mxu3 }
 0x23d   : > { %2588 = vmatmul.msk.bf16.gmra.mxu1 %vm1048_vm0, %v3773_v48  ;;  %1885 = vmatmul.f32.gmra.mxu2 %v1787_v13  ;;  %v1979_v48 = vld [vmem:[%s4293_s5 + $0x30] sm:$0xff]  ;;  %v1627_v13 = vadd.f32 %v1626_v4, %v1578_v28  ;;  %v1592_v4 = vpop.f32.mrf.mxu2 }
 0x23e   : > { %2043 = vmatpush.msra.mxu0 %v1979_v48  ;;  %v1678_v48 = vadd.f32 %v1677_v46, %v1629_v3 }
 0x23f   : > { %v1676_v11 = vadd.f32 %v1675_v45, %v1627_v13 }
 0x240   : > { %2044 = vmatpush.msra.mxu0 %v1978_v27 }
 0x242   : > { %v4136_v6 = vpop.f32.mrf.mxu1  ;;  %2045 = vmatpush.msra.mxu0 %v1977_v63  ;;  %v1451_v63 = vadd.f32 %v4007_v23, %v3793_v2 }
 0x243   : > { %v1636_v44 = vpop.f32.mrf.mxu3 }
 0x244   : > { %2046 = vmatpush.msra.mxu0 %v1976_v17  ;;  %v1456_v17 = vadd.f32 %v4036_v19, %v3793_v2 }
 0x245   : > { %1888 = vmatmul.f32.gmra.mxu2 %v1789_v26  ;;  %v1594_v46 = vpop.f32.mrf.mxu2 }
 0x24a   : > { %v1719_v10 = vpop.f32.mrf.mxu1 }
 0x24b   : > { %v1720_v30 = vadd.f32 %v1719_v10, %v1671_v21  ;;  %v1583_v21 = vadd.f32 %v4109_v49, %v4013_v9  ;;  %v1634_v9 = vadd.f32 %v1633_v41, %v1585_v54 }
 0x24d   : > { %v1760_v60 = vmax.f32 %v1720_v30, 0.0  ;;  %v1685_v30 = vpop.f32.mrf.mxu0  ;;  %v1632_v57 = vadd.f32 %v1631_v7, %v1583_v21  ;;  %v1683_v7 = vadd.f32 %v1682_v39, %v1634_v9  ;;  %v1448_v21 = vadd.f32 %v3989_v42, %v3793_v2  ;;  %v1975_v42 = vld [vmem:[%s4293_s5 + $0x10] sm:$0xff] }
 0x24e   : > { %2047 = vmatpush.msra.mxu0 %v1975_v42 }
 0x24f   : > { %1908 = vmatmul.f32.vlgmr.msra.gmra.mxu3 %v1760_v60  ;;  %v1681_v62 = vadd.f32 %v1680_v51, %v1632_v57  ;;  %v1638_v60 = vpop.f32.mrf.mxu3 }
 0x252   : > { %v1721_v12 = vpop.f32.mrf.mxu1 }
 0x253   : > { %v1722_v24 = vadd.f32 %v1721_v12, %v1673_v8 }
 0x255   : > { %v1762_v53 = vmax.f32 %v1722_v24, 0.0  ;;  %v1687_v12 = vpop.f32.mrf.mxu0  ;;  %v1588_v24 = vadd.f32 %v4128_v58, %v4039_v40  ;;  %v1590_v40 = vadd.f32 %v4138_v15, %v4052_v25  ;;  %v1497_v25 = vadd.f32 %v3998_v59, %v1448_v21 }
 0x256   : > { %v1500_v59 = vadd.f32 %v4015_v35, %v1451_v63 }
 0x257   : > { %1911 = vmatmul.f32.gmra.mxu3 %v1762_v53  ;;  %v1641_v53 = vpop.f32.mrf.mxu3  ;;  %v1637_v51 = vadd.f32 %v1636_v44, %v1588_v24  ;;  %v1639_v3 = vadd.f32 %v1638_v60, %v1590_v40  ;;  %v1505_v40 = vadd.f32 %v4048_v38, %v1456_v17 }
 0x258   : > { %v1549_v23 = vadd.f32 %v4089_v43, %v1500_v59 }
 0x259   : > { %v1686_v39 = vadd.f32 %v1685_v30, %v1637_v51  ;;  %v1554_v19 = vadd.f32 %v4111_v29, %v1505_v40 }
 0x25a   : > { %v1724_v22 = vpop.f32.mrf.mxu1 }
 0x25b   : > { %v1725_v26 = vadd.f32 %v1724_v22, %v1676_v11  ;;  %v1597_v11 = vpop.f32.mrf.mxu2  ;;  %v1495_v22 = vadd.f32 %v3983_v18, %v1446_v14 }
 0x25c   : > { %v1598_v24 = vadd.f32 %v1597_v11, %v1549_v23 }
 0x25d   : > { %v1764_v37 = vmax.f32 %v1725_v26, 0.0  ;;  %v1690_v41 = vpop.f32.mrf.mxu0  ;;  %v1544_v34 = vadd.f32 %v4065_v32, %v1495_v22 }
 0x25f   : > { %1914 = vmatmul.f32.gmra.mxu3 %v1764_v37  ;;  %v1643_v37 = vpop.f32.mrf.mxu3 }
 0x262   : > { %v1726_v50 = vpop.f32.mrf.mxu1 }
 0x263   : > { %v1727_v10 = vadd.f32 %v1726_v50, %v1678_v48  ;;  %v1599_v48 = vpop.f32.mrf.mxu2  ;;  %v1688_v50 = vadd.f32 %v1687_v12, %v1639_v3 }
 0x265   : > { %v1766_v45 = vmax.f32 %v1727_v10, 0.0  ;;  %v1593_v10 = vadd.f32 %v1592_v4, %v1544_v34  ;;  %v1692_v30 = vpop.f32.mrf.mxu0 }
 0x267   : > { %1917 = vmatmul.f32.gmra.mxu3 %v1766_v45  ;;  %v1642_v15 = vadd.f32 %v1641_v53, %v1593_v10  ;;  %v1646_v54 = vpop.f32.mrf.mxu3 }
 0x269   : > { %v1691_v4 = vadd.f32 %v1690_v41, %v1642_v15 }
 0x26a   : > { %v1729_v8 = vpop.f32.mrf.mxu1 }
 0x26b   : > { %v1730_v28 = vadd.f32 %v1729_v8, %v1681_v62  ;;  %v1546_v62 = vadd.f32 %v4076_v20, %v1497_v25  ;;  %v1602_v32 = vpop.f32.mrf.mxu2  ;;  %v1453_v20 = vadd.f32 %v4022_v0, %v3793_v2  ;;  %v1974_v0 = vld [vmem:[%s4293_s5 + $0x8] sm:$0xff] }
 0x26c   : > { %2048 = vmatpush.msra.mxu0 %v1974_v0  ;;  %v1603_v34 = vadd.f32 %v1602_v32, %v1554_v19 }
 0x26d   : > { %v1768_v49 = vmax.f32 %v1730_v28, 0.0  ;;  %v1595_v60 = vadd.f32 %v1594_v46, %v1546_v62  ;;  %v1695_v9 = vpop.f32.mrf.mxu0  ;;  %v1502_v46 = vadd.f32 %v4033_v5, %v1453_v20 }
 0x26f   : > { %1920 = vmatmul.f32.gmra.mxu3 %v1768_v49  ;;  %v1644_v49 = vadd.f32 %v1643_v37, %v1595_v60  ;;  %v1551_v43 = vadd.f32 %v4102_v61, %v1502_v46  ;;  %v1458_v37 = vadd.f32 %v4054_v52, %v3793_v2  ;;  %v1973_v52 = vld [vmem:[%s4293_s5] sm:$0xff] }
 0x270   : > { %2049 = vmatpush.msra.mxu0 %v1973_v52 }
 0x271   : > { %v1600_v41 = vadd.f32 %v1599_v48, %v1551_v43  ;;  %v1507_v48 = vadd.f32 %v4063_v1, %v1458_v37 }
 0x272   : > { %v1731_v13 = vpop.f32.mrf.mxu1 }
 0x273   : > { %v1732_v27 = vadd.f32 %v1731_v13, %v1683_v7  ;;  %v1693_v7 = vadd.f32 %v1692_v30, %v1644_v49  ;;  %v1648_v13 = vpop.f32.mrf.mxu3  ;;  %v1604_v53 = vpop.f32.mrf.mxu2  ;;  %v1556_v29 = vadd.f32 %v4119_v55, %v1507_v48 }
 0x275   : > { %v1770_v33 = vmax.f32 %v1732_v27, 0.0  ;;  %v1697_v14 = vpop.f32.mrf.mxu0  ;;  %v1605_v15 = vadd.f32 %v1604_v53, %v1556_v29 }
 0x277   : > { %1923 = vmatmul.f32.gmra.mxu3 %v1770_v33  ;;  %v1647_v33 = vadd.f32 %v1646_v54, %v1598_v24 }
 0x279   : > { %v1696_v11 = vadd.f32 %v1695_v9, %v1647_v33 }
 0x27a   : > { %v1734_v58 = vpop.f32.mrf.mxu1 }
 0x27b   : > { %v1735_v26 = vadd.f32 %v1734_v58, %v1686_v39  ;;  %v1651_v5 = vpop.f32.mrf.mxu3  ;;  %v1607_v22 = vpop.f32.mrf.mxu2 }
 0x27c   : > { %v1652_v10 = vadd.f32 %v1651_v5, %v1603_v34 }
 0x27d   : > { %v1772_v44 = vmax.f32 %v1735_v26, 0.0  ;;  %v1649_v26 = vadd.f32 %v1648_v13, %v1600_v41  ;;  %v1700_v61 = vpop.f32.mrf.mxu0 }
 0x27e   : > { %v1701_v25 = vadd.f32 %v1700_v61, %v1652_v10 }
 0x27f   : > { %1926 = vmatmul.f32.gmra.mxu3 %v1772_v44  ;;  %v1698_v44 = vadd.f32 %v1697_v14, %v1649_v26 }
 0x282   : > { %v1736_v57 = vpop.f32.mrf.mxu1 }
 0x283   : > { %v1737_v45 = vadd.f32 %v1736_v57, %v1688_v50  ;;  %v1653_v38 = vpop.f32.mrf.mxu3  ;;  %v1609_v57 = vpop.f32.mrf.mxu2 }
 0x284   : > { %v1654_v54 = vadd.f32 %v1653_v38, %v1605_v15 }
 0x285   : > { %v1774_v18 = vmax.f32 %v1737_v45, 0.0  ;;  %v1461_v45 = vadd.f32 %v4074_v16, %v3793_v2 }
 0x287   : > { %1929 = vmatmul.f32.gmra.mxu3 %v1774_v18  ;;  %v1702_v18 = vpop.f32.mrf.mxu0  ;;  %v1510_v1 = vadd.f32 %v4080_v36, %v1461_v45 }
 0x288   : > { %v1703_v60 = vadd.f32 %v1702_v18, %v1654_v54 }
 0x289   : > { %v1559_v32 = vadd.f32 %v4126_v31, %v1510_v1 }
 0x28a   : > { %v1739_v8 = vpop.f32.mrf.mxu1 }
 0x28b   : > { %v1740_v28 = vadd.f32 %v1739_v8, %v1691_v4  ;;  %v1656_v16 = vpop.f32.mrf.mxu3  ;;  %v1844_v55 = vpop.f32.mrf.mxu2  ;;  %v1463_v4 = vadd.f32 %v4087_v56, %v3793_v2  ;;  %v1608_v8 = vadd.f32 %v1607_v22, %v1559_v32 }
 0x28d   : > { %v1776_v12 = vmax.f32 %v1740_v28, 0.0  ;;  %v1512_v49 = vadd.f32 %v4098_v47, %v1463_v4 }
 0x28f   : > { %1932 = vmatmul.f32.gmra.mxu3 %v1776_v12  ;;  %v1705_v9 = vpop.f32.mrf.mxu0  ;;  %v1657_v12 = vadd.f32 %v1656_v16, %v1608_v8  ;;  %v1561_v23 = vadd.f32 %v4136_v6, %v1512_v49  ;;  %v4210_v6 = vld [vmem:[%s4292_s4] ss:$0 sm:$0xff] }
 0x290   : > { %v1845_v17 = vadd.f32 %v4210_v6, %v1844_v55 }
 0x291   : > { %v1706_v20 = vadd.f32 %v1705_v9, %v1657_v12  ;;  %v1610_v31 = vadd.f32 %v1609_v57, %v1561_v23 }
 0x292   : > { %v1741_v27 = vpop.f32.mrf.mxu1 }
 0x293   : > { %v1742_v51 = vadd.f32 %v1741_v27, %v1693_v7  ;;  %v1658_v7 = vpop.f32.mrf.mxu3  ;;  %v1847_v24 = vpop.f32.mrf.mxu2 }
 0x294   : > { %v1659_v27 = vadd.f32 %v1658_v7, %v1610_v31 }
 0x295   : > { %v1778_v35 = vmax.f32 %v1742_v51, 0.0 }
 0x297   : > { %1935 = vmatmul.f32.gmra.mxu3 %v1778_v35  ;;  %v1707_v56 = vpop.f32.mrf.mxu0 }
 0x298   : > { %v1708_v51 = vadd.f32 %v1707_v56, %v1659_v27 }
 0x29a   : > { %v1744_v39 = vpop.f32.mrf.mxu1 }
 0x29b   : > { %v1745_v58 = vadd.f32 %v1744_v39, %v1696_v11  ;;  %v1850_v35 = vpop.f32.mrf.mxu2  ;;  %v1848_v39 = vadd.f32 %v4210_v6, %v1847_v24 }
 0x29c   : > { %v1851_v22 = vadd.f32 %v4210_v6, %v1850_v35 }
 0x29d   : > { %v1780_v3 = vmax.f32 %v1745_v58, 0.0 }
 0x29f   : > { %1938 = vmatmul.f32.gmra.mxu3 %v1780_v3 }
 0x2a2   : > { %v1746_v21 = vpop.f32.mrf.mxu1 }
 0x2a3   : > { %v1747_v50 = vadd.f32 %v1746_v21, %v1698_v44  ;;  %v1853_v14 = vpop.f32.mrf.mxu2 }
 0x2a4   : > { %v1854_v37 = vadd.f32 %v4210_v6, %v1853_v14 }
 0x2a5   : > { %v1782_v30 = vmax.f32 %v1747_v50, 0.0 }
 0x2a7   : > { %1941 = vmatmul.f32.gmra.mxu3 %v1782_v30 }
 0x2aa   : > { %v1749_v63 = vpop.f32.mrf.mxu1 }
 0x2ab   : > { %v1750_v62 = vadd.f32 %v1749_v63, %v1701_v25  ;;  %v1856_v41 = vpop.f32.mrf.mxu2 }
 0x2ac   : > { %v1857_v48 = vadd.f32 %v4210_v6, %v1856_v41 }
 0x2ad   : > { %v1784_v42 = vmax.f32 %v1750_v62, 0.0 }
 0x2af   : > { %1944 = vmatmul.f32.gmra.mxu3 %v1784_v42 }
 0x2b2   : > { %v1751_v59 = vpop.f32.mrf.mxu1 }
 0x2b3   : > { %v1752_v28 = vadd.f32 %v1751_v59, %v1703_v60  ;;  %v1859_v26 = vpop.f32.mrf.mxu2 }
 0x2b4   : > { %v1860_v45 = vadd.f32 %v4210_v6, %v1859_v26 }
 0x2b5   : > { %v1786_v36 = vmax.f32 %v1752_v28, 0.0 }
 0x2b7   : > { %1947 = vmatmul.f32.gmra.mxu3 %v1786_v36 }
 0x2ba   : > { %v1754_v13 = vpop.f32.mrf.mxu1 }
 0x2bb   : > { %v1755_v53 = vadd.f32 %v1754_v13, %v1706_v20  ;;  %v1862_v21 = vpop.f32.mrf.mxu2 }
 0x2bc   : > { %v1863_v18 = vadd.f32 %v4210_v6, %v1862_v21 }
 0x2bd   : > { %v1788_v2 = vmax.f32 %v1755_v53, 0.0 }
 0x2bf   : > { %1950 = vmatmul.f32.gmra.mxu3 %v1788_v2 }
 0x2c2   : > { %v1756_v46 = vpop.f32.mrf.mxu1 }
 0x2c3   : > { %v1757_v33 = vadd.f32 %v1756_v46, %v1708_v51  ;;  %v1865_v57 = vpop.f32.mrf.mxu2 }
 0x2c4   : > { %v1866_v54 = vadd.f32 %v4210_v6, %v1865_v57 }
 0x2c5   : > { %v1790_v47 = vmax.f32 %v1757_v33, 0.0 }
 0x2c7   : > { %1953 = vmatmul.f32.gmra.mxu3 %v1790_v47 }
 0x2cb   : > { %v1868_v15 = vpop.f32.mrf.mxu2 }
 0x2cc   : > { %v1869_v4 = vadd.f32 %v4210_v6, %v1868_v15 }
 0x2d2   : > { %v1909_v43 = vpop.f32.mrf.mxu3 }
 0x2d3   : > { %v1910_v0 = vadd.f32 %v1909_v43, %v1845_v17  ;;  %v1871_v42 = vpop.f32.mrf.mxu2 }
 0x2d4   : > { %v1872_v9 = vadd.f32 %v4210_v6, %v1871_v42 }
 0x2d5   : > { %v1957_v11 = vmax.f32 %v1910_v0, 0.0 }
 0x2d7   : > { %2589 = vmatmul.msk.f32.vlgmr.msra.gmra.mxu0 %vm1985_vm1, %v1957_v11 }
 0x2da   : > { %v1912_v40 = vpop.f32.mrf.mxu3 }
 0x2db   : > { %v1913_v5 = vadd.f32 %v1912_v40, %v1848_v39  ;;  %v1874_v59 = vpop.f32.mrf.mxu2 }
 0x2dc   : > { %v1875_v20 = vadd.f32 %v4210_v6, %v1874_v59 }
 0x2dd   : > { %v1958_v58 = vmax.f32 %v1913_v5, 0.0 }
 0x2df   : > { %2590 = vmatmul.msk.f32.gmra.mxu0 %vm1985_vm1, %v1958_v58 }
 0x2e2   : > { %v1915_v3 = vpop.f32.mrf.mxu3 }
 0x2e3   : > { %v1916_v19 = vadd.f32 %v1915_v3, %v1851_v22  ;;  %v1877_v23 = vpop.f32.mrf.mxu2 }
 0x2e4   : > { %v1878_v53 = vadd.f32 %v4210_v6, %v1877_v23 }
 0x2e5   : > { %v1959_v61 = vmax.f32 %v1916_v19, 0.0 }
 0x2e7   : > { %2591 = vmatmul.msk.f32.gmra.mxu0 %vm1985_vm1, %v1959_v61  ;;  %v2739_v61 = vld [vmem:[%s4294_s6] ss:$0 sm:$0xff] }
 0x2ea   : > { %v1918_v44 = vpop.f32.mrf.mxu3 }
 0x2eb   : > { %v1919_v34 = vadd.f32 %v1918_v44, %v1854_v37  ;;  %v1880_v13 = vpop.f32.mrf.mxu2 }
 0x2ec   : > { %v1881_v51 = vadd.f32 %v4210_v6, %v1880_v13 }
 0x2ed   : > { %v1960_v50 = vmax.f32 %v1919_v34, 0.0 }
 0x2ef   : > { %2592 = vmatmul.msk.f32.gmra.mxu0 %vm1985_vm1, %v1960_v50 }
 0x2f2   : > { %v1921_v10 = vpop.f32.mrf.mxu3 }
 0x2f3   : > { %v1922_v38 = vadd.f32 %v1921_v10, %v1857_v48  ;;  %v1883_v46 = vpop.f32.mrf.mxu2 }
 0x2f4   : > { %v1884_v14 = vadd.f32 %v4210_v6, %v1883_v46 }
 0x2f5   : > { %v1961_v30 = vmax.f32 %v1922_v38, 0.0 }
 0x2f7   : > { %2593 = vmatmul.msk.f32.gmra.mxu0 %vm1985_vm1, %v1961_v30 }
 0x2fa   : > { %v1924_v29 = vpop.f32.mrf.mxu3 }
 0x2fb   : > { %v1925_v52 = vadd.f32 %v1924_v29, %v1860_v45  ;;  %v1886_v0 = vpop.f32.mrf.mxu2 }
 0x2fc   : > { %v1887_v41 = vadd.f32 %v4210_v6, %v1886_v0 }
 0x2fd   : > { %v1962_v25 = vmax.f32 %v1925_v52, 0.0 }
 0x2ff   : > { %2594 = vmatmul.msk.f32.gmra.mxu0 %vm1985_vm1, %v1962_v25 }
 0x302   : > { %v1927_v63 = vpop.f32.mrf.mxu3 }
 0x303   : > { %v1928_v1 = vadd.f32 %v1927_v63, %v1863_v18  ;;  %v1889_v58 = vpop.f32.mrf.mxu2 }
 0x304   : > { %v1890_v22 = vadd.f32 %v4210_v6, %v1889_v58 }
 0x305   : > { %v1963_v62 = vmax.f32 %v1928_v1, 0.0 }
 0x307   : > { %2595 = vmatmul.msk.f32.gmra.mxu0 %vm1985_vm1, %v1963_v62 }
 0x30a   : > { %v1930_v32 = vpop.f32.mrf.mxu3 }
 0x30b   : > { %v1931_v16 = vadd.f32 %v1930_v32, %v1866_v54 }
 0x30d   : > { %v1964_v55 = vmax.f32 %v1931_v16, 0.0 }
 0x30f   : > { %2596 = vmatmul.msk.f32.gmra.mxu0 %vm1985_vm1, %v1964_v55 }
 0x312   : > { %v1933_v60 = vpop.f32.mrf.mxu3 }
 0x313   : > { %v1934_v8 = vadd.f32 %v1933_v60, %v1869_v4 }
 0x315   : > { %v1965_v28 = vmax.f32 %v1934_v8, 0.0 }
 0x317   : > { %2597 = vmatmul.msk.f32.gmra.mxu0 %vm1985_vm1, %v1965_v28 }
 0x31a   : > { %v1936_v49 = vpop.f32.mrf.mxu3 }
 0x31b   : > { %v1937_v12 = vadd.f32 %v1936_v49, %v1872_v9 }
 0x31d   : > { %v1966_v36 = vmax.f32 %v1937_v12, 0.0 }
 0x31f   : > { %2598 = vmatmul.msk.f32.gmra.mxu0 %vm1985_vm1, %v1966_v36 }
 0x322   : > { %v1939_v31 = vpop.f32.mrf.mxu3 }
 0x323   : > { %v1940_v7 = vadd.f32 %v1939_v31, %v1875_v20 }
 0x325   : > { %v1967_v24 = vmax.f32 %v1940_v7, 0.0 }
 0x327   : > { %2599 = vmatmul.msk.f32.gmra.mxu0 %vm1985_vm1, %v1967_v24 }
 0x32a   : > { %v1942_v27 = vpop.f32.mrf.mxu3 }
 0x32b   : > { %v1943_v2 = vadd.f32 %v1942_v27, %v1878_v53 }
 0x32d   : > { %v1968_v56 = vmax.f32 %v1943_v2, 0.0 }
 0x32f   : > { %2600 = vmatmul.msk.f32.gmra.mxu0 %vm1985_vm1, %v1968_v56 }
 0x332   : > { %v1945_v33 = vpop.f32.mrf.mxu3 }
 0x333   : > { %v1946_v35 = vadd.f32 %v1945_v33, %v1881_v51 }
 0x335   : > { %v1969_v47 = vmax.f32 %v1946_v35, 0.0 }
 0x337   : > { %2601 = vmatmul.msk.f32.gmra.mxu0 %vm1985_vm1, %v1969_v47 }
 0x33a   : > { %v1948_v17 = vpop.f32.mrf.mxu3 }
 0x33b   : > { %v1949_v43 = vadd.f32 %v1948_v17, %v1884_v14 }
 0x33d   : > { %v1970_v11 = vmax.f32 %v1949_v43, 0.0 }
 0x33f   : > { %2602 = vmatmul.msk.f32.gmra.mxu0 %vm1985_vm1, %v1970_v11 }
 0x342   : > { %v1951_v39 = vpop.f32.mrf.mxu3 }
 0x343   : > { %v1952_v40 = vadd.f32 %v1951_v39, %v1887_v41 }
 0x345   : > { %v1971_v5 = vmax.f32 %v1952_v40, 0.0 }
 0x347   : > { %2603 = vmatmul.msk.f32.gmra.mxu0 %vm1985_vm1, %v1971_v5 }
 0x34a   : > { %v1954_v26 = vpop.f32.mrf.mxu3 }
 0x34b   : > { %v1955_v3 = vadd.f32 %v1954_v26, %v1890_v22 }
 0x34d   : > { %v1972_v19 = vmax.f32 %v1955_v3, 0.0 }
 0x34f   : > { %2604 = vmatmul.msk.f32.gmra.mxu0 %vm1985_vm1, %v1972_v19 }
 0x354   : > { %v2051_v6 = vpop.f32.mrf.mxu0 }
 0x355   : > { %v2052_v37 = vadd.f32 %v2739_v61, %v2051_v6 }
 0x357   : > { %2100 = vst.msk [vmem:[%s4251_s23] sm:$0xff] %vm2099_vm2, %v2052_v37 }
 0x35c   : > { %v2054_v44 = vpop.f32.mrf.mxu0 }
 0x35d   : > { %v2055_v34 = vadd.f32 %v2739_v61, %v2054_v44 }
 0x35f   : > { %2101 = vst.msk [vmem:[%s4251_s23 + $0x8] sm:$0xff] %vm2099_vm2, %v2055_v34 }
 0x364   : > { %v2057_v21 = vpop.f32.mrf.mxu0 }
 0x365   : > { %v2058_v50 = vadd.f32 %v2739_v61, %v2057_v21 }
 0x367   : > { %2102 = vst.msk [vmem:[%s4251_s23 + $0x10] sm:$0xff] %vm2099_vm2, %v2058_v50 }
 0x36c   : > { %v2060_v48 = vpop.f32.mrf.mxu0 }
 0x36d   : > { %v2061_v10 = vadd.f32 %v2739_v61, %v2060_v48 }
 0x36f   : > { %2103 = vst.msk [vmem:[%s4251_s23 + $0x18] sm:$0xff] %vm2099_vm2, %v2061_v10 }
 0x374   : > { %v2063_v38 = vpop.f32.mrf.mxu0 }
 0x375   : > { %v2064_v30 = vadd.f32 %v2739_v61, %v2063_v38 }
 0x377   : > { %2104 = vst.msk [vmem:[%s4251_s23 + $0x20] sm:$0xff] %vm2099_vm2, %v2064_v30 }
 0x37c   : > { %v2066_v57 = vpop.f32.mrf.mxu0 }
 0x37d   : > { %v2067_v45 = vadd.f32 %v2739_v61, %v2066_v57 }
 0x37f   : > { %2105 = vst.msk [vmem:[%s4251_s23 + $0x28] sm:$0xff] %vm2099_vm2, %v2067_v45 }
 0x384   : > { %v2069_v29 = vpop.f32.mrf.mxu0 }
 0x385   : > { %v2070_v52 = vadd.f32 %v2739_v61, %v2069_v29 }
 0x387   : > { %2106 = vst.msk [vmem:[%s4251_s23 + $0x30] sm:$0xff] %vm2099_vm2, %v2070_v52 }
 0x38c   : > { %v2072_v25 = vpop.f32.mrf.mxu0 }
 0x38d   : > { %v2073_v15 = vadd.f32 %v2739_v61, %v2072_v25 }
 0x38f   : > { %2107 = vst.msk [vmem:[%s4251_s23 + $0x38] sm:$0xff] %vm2099_vm2, %v2073_v15 }
 0x394   : > { %v2075_v18 = vpop.f32.mrf.mxu0 }
 0x395   : > { %v2076_v63 = vadd.f32 %v2739_v61, %v2075_v18 }
 0x397   : > { %2108 = vst.msk [vmem:[%s4251_s23 + $0x40] sm:$0xff] %vm2099_vm2, %v2076_v63 }
 0x39c   : > { %v2078_v1 = vpop.f32.mrf.mxu0 }
 0x39d   : > { %v2079_v62 = vadd.f32 %v2739_v61, %v2078_v1 }
 0x39f   : > { %2109 = vst.msk [vmem:[%s4251_s23 + $0x48] sm:$0xff] %vm2099_vm2, %v2079_v62 }
 0x3a4   : > { %v2081_v54 = vpop.f32.mrf.mxu0 }
 0x3a5   : > { %v2082_v42 = vadd.f32 %v2739_v61, %v2081_v54 }
 0x3a7   : > { %2110 = vst.msk [vmem:[%s4251_s23 + $0x50] sm:$0xff] %vm2099_vm2, %v2082_v42 }
 0x3ac   : > { %v2084_v32 = vpop.f32.mrf.mxu0 }
 0x3ad   : > { %v2085_v16 = vadd.f32 %v2739_v61, %v2084_v32 }
 0x3af   : > { %2111 = vst.msk [vmem:[%s4251_s23 + $0x58] sm:$0xff] %vm2099_vm2, %v2085_v16 }
 0x3b4   : > { %v2087_v55 = vpop.f32.mrf.mxu0 }
 0x3b5   : > { %v2088_v4 = vadd.f32 %v2739_v61, %v2087_v55 }
 0x3b7   : > { %2112 = vst.msk [vmem:[%s4251_s23 + $0x60] sm:$0xff] %vm2099_vm2, %v2088_v4 }
 0x3bc   : > { %v2090_v60 = vpop.f32.mrf.mxu0 }
 0x3bd   : > { %v2091_v8 = vadd.f32 %v2739_v61, %v2090_v60 }
 0x3bf   : > { %2113 = vst.msk [vmem:[%s4251_s23 + $0x68] sm:$0xff] %vm2099_vm2, %v2091_v8 }
 0x3c4   : > { %v2093_v59 = vpop.f32.mrf.mxu0 }
 0x3c5   : > { %v2094_v28 = vadd.f32 %v2739_v61, %v2093_v59 }
 0x3c7   : > { %2114 = vst.msk [vmem:[%s4251_s23 + $0x70] sm:$0xff] %vm2099_vm2, %v2094_v28 }
 0x3cc   : > { %v2096_v9 = vpop.f32.mrf.mxu0 }
 0x3cd   : > { %v2097_v49 = vadd.f32 %v2739_v61, %v2096_v9 }
 0x3cf   : > { %2115 = vst.msk [vmem:[%s4251_s23 + $0x78] sm:$0xff] %vm2099_vm2, %v2097_v49 }
 0x3d0 PF: > { %s17_s24 = sadd.s32 1, %s2746_s24  }
 0x3d1   : > { %p14_p4 = scmp.ge.s32.totalorder %s17_s24, 4  }
 0x3d3   :  { %16 = sbr.rel (!%p14_p4) target bundleno = 1 (0x1), region = 78 }

</bundles_post_ra>
